<compile_context>
chip_gen: v5e
topology: v5e:2x2
jax: 0.10.0
libtpu: 0.0.40
codegen_flags: <defaults>
</compile_context>

<pallas_src>
import functools

import jax
import jax.numpy as jnp
from jax.experimental import pallas as pl
from jax.experimental.pallas import tpu as pltpu


# ---------------------------------------------------------------------------
# Kernel
# ---------------------------------------------------------------------------
def nonlocal_kernel(x_ref, w3_ref, o_ref, *scratch, hid, c, m_tile, nb,
                    matmul_dtype, exact_softmax):
    """NonLocalBlock forward for one grid step.

    x block:  (nb, C, N)   native (C, N) layout, N = H*W in the lane dim.
    w3:       (2*hid + C, C) == concat([W_theta, W_phi, W_mask @ W_g])
    o block:  (nb, C, N)
    scratch (large-N path only):
      pg_ref:  (hid + C, N) f32  -- phi rows then (W_mask@W_g)x rows
      acc_ref: (C, N)      f32  -- output-channel accumulator
    """
    n = x_ref.shape[-1]
    num_m = n // m_tile
    use_scratch = bool(scratch)

    def maybe_cast(v):
        return v if matmul_dtype is None else v.astype(matmul_dtype)

    def softmax_rows(sT):
        # torch Softmax(dim=1) == normalize each m-row of sT over the lane axis,
        # so no cross-tile online rescaling is needed.
        mmax = jnp.max(sT, axis=-1, keepdims=True)
        p = jnp.exp(sT - mmax)
        l = jnp.sum(p, axis=-1, keepdims=True)
        if exact_softmax:
            return p / l
        return p * pl.reciprocal(l, approx=True)

    for bi in range(nb):
        x = x_ref[bi]                                               # (C, N)
        # Fused theta / phi / (W_mask o g) projections: one MXU launch, f32 acc.
        proj = jnp.dot(w3_ref[...], maybe_cast(x),
                       preferred_element_type=jnp.float32)          # (2*hid+C, N)
        theta = maybe_cast(proj[0:hid])                             # (hid, N)

        if not use_scratch:
            # Small-N path: vreg-resident, static slices, value accumulator.
            phi = maybe_cast(proj[hid:2 * hid])                     # (hid, N)
            gm = maybe_cast(proj[2 * hid:])                         # (C, N)
            acc = jnp.zeros((c, n), jnp.float32)
            for t in range(num_m):
                sl = slice(t * m_tile, (t + 1) * m_tile)
                phi_t = phi[:, sl]                                  # (hid, Tm)
                gm_t = gm[:, sl]                                    # (C, Tm)
                # sT[m, n] = <phi_m, theta_n>: contract over hid (sublane) axis
                # of both operands — no XLU transpose of phi_t.
                sT = jax.lax.dot_general(
                    phi_t, theta, (((0,), (0,)), ((), ())),
                    preferred_element_type=jnp.float32)             # (Tm, N)
                attn_t = softmax_rows(sT)                           # (Tm, N)
                acc = acc + jnp.dot(gm_t, maybe_cast(attn_t),
                                    preferred_element_type=jnp.float32)
            o_ref[bi] = (x + acc).astype(o_ref.dtype)
        else:
            # Large-N path: live VMEM bounded to O(m_tile * N); phi and folded-g
            # kept in ONE contiguous scratch (single vst), accumulator in VMEM.
            pg_ref, acc_ref = scratch
            pg_ref[...] = proj[hid:]                                # (hid+C, N)
            acc_ref[...] = jnp.zeros_like(acc_ref)

            def body(t, carry):
                m0 = pl.multiple_of(t * m_tile, m_tile)
                phi_t = maybe_cast(pg_ref[0:hid, pl.ds(m0, m_tile)])   # (hid, Tm)
                gm_t = maybe_cast(pg_ref[hid:, pl.ds(m0, m_tile)])     # (C, Tm)
                sT = jax.lax.dot_general(
                    phi_t, theta, (((0,), (0,)), ((), ())),
                    preferred_element_type=jnp.float32)                # (Tm, N)
                attn_t = softmax_rows(sT)
                acc_ref[...] += jnp.dot(gm_t, maybe_cast(attn_t),
                                        preferred_element_type=jnp.float32)
                return carry

            jax.lax.fori_loop(0, num_m, body, 0)
            o_ref[bi] = (x + acc_ref[...]).astype(o_ref.dtype)


# ---------------------------------------------------------------------------
# Wrapper / configuration
# ---------------------------------------------------------------------------
def _device_kind():
    try:
        return jax.devices()[0].device_kind.lower()
    except Exception:
        return ""


def _pick_m_tile(n, device_kind):
    # Bound the live (m_tile, N) softmax slab; v7x has half the VMEM of
    # v5e/v6e, so cap harder there once N is large.
    cap = 256 if ("v7" in device_kind and n >= 2048) else 512
    if n <= cap:
        return n
    for t in range(cap - cap % 8, 7, -8):        # largest 8-multiple divisor
        if n % t == 0:
            return t
    return n                                     # no divisor: run untiled


def _vmem_limit_bytes(nb, c, n, hid, m_tile, itemsize, use_scratch):
    io = 2 * 2 * nb * c * n * itemsize                      # x + out, dbl-buffered
    wts = 2 * (2 * hid + c) * c * itemsize
    scratch = ((hid + c) * n + c * n) * 4 if use_scratch else 0
    live = ((2 * hid + c) * n + 3 * m_tile * n + 3 * c * n) * 4
    est = io + wts + scratch + live
    # Clamp to a range that is safe on v5e / v6e (128 MiB) and v7x (64 MiB).
    return int(min(32 * 1024 * 1024, max(16 * 1024 * 1024, 2 * est)))


def nonlocal_block(x, w_theta, w_phi, w_g, w_mask, *, m_tile=None,
                   fold_batch=None, max_unrolled=8, matmul_dtype=None,
                   exact_softmax=False):
    """x: (B, C, H, W) NCHW.  Conv2d weights: (out_ch, in_ch, 1, 1), no bias."""
    b, c, h, w = x.shape
    hid = w_theta.shape[0]
    n = h * w
    kind = _device_kind()

    if m_tile is None or n % m_tile != 0:
        m_tile = _pick_m_tile(n, kind)
    num_m = n // m_tile
    use_scratch = num_m > max_unrolled

    # Single-TC chips (v5e/v6e): fold the whole (small) batch into one grid
    # step to amortize per-step overhead and the weight DMA; on v7x keep
    # grid=(B,) + "parallel" so both TensorCores get a batch element.
    if fold_batch is None:
        fold_batch = (b > 1) and ("v7" not in kind)
    nb = b if fold_batch else 1

    # Layout glue (no transposes): flatten spatial only; fuse projection
    # weights and fold W_mask into g (exact: (Wm Wg) x == Wm (Wg x)).
    x_flat = x.reshape(b, c, n)                                  # (B, C, N)
    wt = w_theta.reshape(hid, c)
    wp = w_phi.reshape(hid, c)
    wg = w_g.reshape(hid, c)
    wm = w_mask.reshape(c, hid)
    w3 = jnp.concatenate([wt, wp, wm @ wg], axis=0).astype(x.dtype)  # (2*hid+C, C)

    kernel = functools.partial(
        nonlocal_kernel, hid=hid, c=c, m_tile=m_tile, nb=nb,
        matmul_dtype=matmul_dtype, exact_softmax=exact_softmax)

    scratch_shapes = []
    if use_scratch:
        # TODO(synk): at very large N this scratch could be stored in bf16 to
        # halve scratch bytes (f32 accumulation is kept in acc_ref either way).
        scratch_shapes = [pltpu.VMEM((hid + c, n), jnp.float32),
                          pltpu.VMEM((c, n), jnp.float32)]

    out_flat = pl.pallas_call(
        kernel,
        out_shape=jax.ShapeDtypeStruct((b, c, n), x.dtype),
        grid_spec=pltpu.PrefetchScalarGridSpec(
            num_scalar_prefetch=0,
            grid=(b // nb,),
            in_specs=[
                pl.BlockSpec((nb, c, n), lambda i: (i, 0, 0)),       # x
                pl.BlockSpec((2 * hid + c, c), lambda i: (0, 0)),    # fused weights
            ],
            out_specs=pl.BlockSpec((nb, c, n), lambda i: (i, 0, 0)),
            scratch_shapes=scratch_shapes,
        ),
        compiler_params=pltpu.CompilerParams(
            dimension_semantics=("parallel",),
            vmem_limit_bytes=_vmem_limit_bytes(
                nb, c, n, hid, m_tile, x.dtype.itemsize, use_scratch),
        ),
    )(x_flat, w3)

    return out_flat.reshape(b, c, h, w)


# ---------------------------------------------------------------------------
# Pure-JAX reference (mirrors the PyTorch forward exactly, no weight folding)
# ---------------------------------------------------------------------------
def nonlocal_reference(x, w_theta, w_phi, w_g, w_mask):
    b, c, h, w = x.shape
    hid = w_theta.shape[0]
    n = h * w
    wt = w_theta.reshape(hid, c)
    wp = w_phi.reshape(hid, c)
    wg = w_g.reshape(hid, c)
    wm = w_mask.reshape(c, hid)

    theta = jnp.einsum("oc,bcn->bno", wt, x.reshape(b, c, n))    # (B, N, hid)
    phi = jnp.einsum("oc,bcn->bon", wp, x.reshape(b, c, n))      # (B, hid, N)
    g = jnp.einsum("oc,bcn->bno", wg, x.reshape(b, c, n))        # (B, N, hid)
    s = jnp.einsum("bno,bom->bnm", theta, phi)                   # (B, N, N)
    attn = jax.nn.softmax(s, axis=1)                             # dim=1, as in torch
    y = jnp.einsum("bnm,bmo->bno", attn, g)                      # (B, N, hid)
    mask = jnp.einsum("co,bno->bcn", wm, y).reshape(b, c, h, w)
    return x + mask


if __name__ == "__main__":
    B, C, HID, H, W = 2, 4, 8, 16, 16

    key = jax.random.PRNGKey(0)
    kx, k1, k2, k3, k4 = jax.random.split(key, 5)
    x = jax.random.normal(kx, (B, C, H, W), dtype=jnp.float32)

    # Conv2d-shaped weights (out_ch, in_ch, 1, 1), no bias.
    w_theta = jax.random.normal(k1, (HID, C, 1, 1), dtype=jnp.float32) * 0.1
    w_phi   = jax.random.normal(k2, (HID, C, 1, 1), dtype=jnp.float32) * 0.1
    w_g     = jax.random.normal(k3, (HID, C, 1, 1), dtype=jnp.float32) * 0.1
    w_mask  = jax.random.normal(k4, (C, HID, 1, 1), dtype=jnp.float32) * 0.1

    ref = nonlocal_reference(x, w_theta, w_phi, w_g, w_mask)

    # 1) Default config (auto m_tile / fold_batch; vreg-resident path).
    out = jax.block_until_ready(nonlocal_block(x, w_theta, w_phi, w_g, w_mask))
    assert out.shape == (B, C, H, W)
    assert jnp.allclose(out, ref, atol=1e-4, rtol=1e-4), "mismatch (default)"

    # 2) Tiled similarity (m_tile=128, 2 unrolled iters) with grid over batch.
    out2 = jax.block_until_ready(
        nonlocal_block(x, w_theta, w_phi, w_g, w_mask, m_tile=128,
                       fold_batch=False))
    assert jnp.allclose(out2, ref, atol=1e-4, rtol=1e-4), "mismatch (tiled)"

    # 3) Large-N style path: VMEM scratch + fori_loop over m tiles.
    out3 = jax.block_until_ready(
        nonlocal_block(x, w_theta, w_phi, w_g, w_mask, m_tile=128,
                       fold_batch=True, max_unrolled=1))
    assert jnp.allclose(out3, ref, atol=1e-4, rtol=1e-4), "mismatch (scratch)"

    print("KERNEL_OK")
</pallas_src>

<mosaic_0001>
module attributes {stable_mosaic.version = 11 : i64} {
  func.func @nonlocal_kernel(%arg0: i32, %arg1: memref<2x4x256xf32, #tpu.memory_space<vmem>>, %arg2: memref<20x4xf32, #tpu.memory_space<vmem>>, %arg3: memref<2x4x256xf32, #tpu.memory_space<vmem>>) attributes {dimension_semantics = [#tpu.dimension_semantics<parallel>], iteration_bounds = array<i64: 1>, scalar_prefetch = 0 : i64, scratch_operands = 0 : i64, tpu.core_type = #tpu.core_type<tc>, window_params = [{transform_indices = @transform_0, window_bounds = array<i64: 2, 4, 256>}, {pipeline_mode = #tpu.pipeline_mode<synchronous>, transform_indices = @transform_1, window_bounds = array<i64: 20, 4>}, {transform_indices = @transform_2, window_bounds = array<i64: 2, 4, 256>}]} {
    %c0 = arith.constant 0 : index
    %c0_0 = arith.constant 0 : index
    %c0_1 = arith.constant 0 : index
    %0 = vector.load %arg1[%c0, %c0_0, %c0_1] : memref<2x4x256xf32, #tpu.memory_space<vmem>>, vector<1x4x256xf32>
    %1 = vector.shape_cast %0 : vector<1x4x256xf32> to vector<4x256xf32>
    %c0_2 = arith.constant 0 : index
    %c0_3 = arith.constant 0 : index
    %2 = vector.load %arg2[%c0_2, %c0_3] : memref<20x4xf32, #tpu.memory_space<vmem>>, vector<20x4xf32>
    %cst = arith.constant dense<0.000000e+00> : vector<20x256xf32>
    %3 = tpu.matmul %2, %1, %cst {dimension_numbers = #tpu.dot_dimension_numbers<[1], [0], [0], [1], [0, 0, 1, 1], [], []>} : vector<20x4xf32>, vector<4x256xf32>, vector<20x256xf32> -> vector<20x256xf32>
    %4 = vector.extract_strided_slice %3 {offsets = [0, 0], sizes = [8, 256], strides = [1, 1]} : vector<20x256xf32> to vector<8x256xf32>
    %5 = vector.extract_strided_slice %3 {offsets = [8, 0], sizes = [8, 256], strides = [1, 1]} : vector<20x256xf32> to vector<8x256xf32>
    %6 = vector.extract_strided_slice %3 {offsets = [16, 0], sizes = [4, 256], strides = [1, 1]} : vector<20x256xf32> to vector<4x256xf32>
    %cst_4 = arith.constant 0.000000e+00 : f32
    %7 = vector.broadcast %cst_4 : f32 to vector<4x256xf32>
    %cst_5 = arith.constant dense<0.000000e+00> : vector<256x256xf32>
    %8 = tpu.matmul %5, %4, %cst_5 {dimension_numbers = #tpu.dot_dimension_numbers<[0], [0], [1], [1], [0, 1, 1, 1], [], []>} : vector<8x256xf32>, vector<8x256xf32>, vector<256x256xf32> -> vector<256x256xf32>
    %cst_6 = arith.constant dense<0xFF800000> : vector<256xf32>
    %9 = vector.multi_reduction <maximumf>, %8, %cst_6 [1] : vector<256x256xf32> to vector<256xf32>
    %10 = vector.shape_cast %9 : vector<256xf32> to vector<256x1xf32>
    %11 = vector.broadcast %10 : vector<256x1xf32> to vector<256x256xf32>
    %12 = arith.subf %8, %11 : vector<256x256xf32>
    %13 = math.exp %12 : vector<256x256xf32>
    %cst_7 = arith.constant dense<0.000000e+00> : vector<256xf32>
    %14 = vector.multi_reduction <add>, %13, %cst_7 [1] : vector<256x256xf32> to vector<256xf32>
    %15 = vector.shape_cast %14 : vector<256xf32> to vector<256x1xf32>
    %16 = tpu.reciprocal %15 {approx = true} : vector<256x1xf32> -> vector<256x1xf32>
    %17 = vector.broadcast %16 : vector<256x1xf32> to vector<256x256xf32>
    %18 = arith.mulf %13, %17 : vector<256x256xf32>
    %cst_8 = arith.constant dense<0.000000e+00> : vector<4x256xf32>
    %19 = tpu.matmul %6, %18, %cst_8 {dimension_numbers = #tpu.dot_dimension_numbers<[1], [0], [0], [1], [0, 0, 1, 1], [], []>} : vector<4x256xf32>, vector<256x256xf32>, vector<4x256xf32> -> vector<4x256xf32>
    %20 = arith.addf %7, %19 : vector<4x256xf32>
    %21 = arith.addf %1, %20 : vector<4x256xf32>
    %c0_9 = arith.constant 0 : index
    %c0_10 = arith.constant 0 : index
    %c0_11 = arith.constant 0 : index
    %22 = vector.load %arg3[%c0_9, %c0_10, %c0_11] : memref<2x4x256xf32, #tpu.memory_space<vmem>>, vector<1x4x256xf32>
    %23 = vector.shape_cast %22 : vector<1x4x256xf32> to vector<4x256xf32>
    %24 = vector.shape_cast %21 : vector<4x256xf32> to vector<1x4x256xf32>
    tpu.vector_store %arg3[%c0_9, %c0_10, %c0_11], %24 {strides = array<i32>} : memref<2x4x256xf32, #tpu.memory_space<vmem>>, vector<1x4x256xf32>,
    %c1 = arith.constant 1 : index
    %c0_12 = arith.constant 0 : index
    %c0_13 = arith.constant 0 : index
    %25 = vector.load %arg1[%c1, %c0_12, %c0_13] : memref<2x4x256xf32, #tpu.memory_space<vmem>>, vector<1x4x256xf32>
    %26 = vector.shape_cast %25 : vector<1x4x256xf32> to vector<4x256xf32>
    %c0_14 = arith.constant 0 : index
    %c0_15 = arith.constant 0 : index
    %27 = vector.load %arg2[%c0_14, %c0_15] : memref<20x4xf32, #tpu.memory_space<vmem>>, vector<20x4xf32>
    %cst_16 = arith.constant dense<0.000000e+00> : vector<20x256xf32>
    %28 = tpu.matmul %27, %26, %cst_16 {dimension_numbers = #tpu.dot_dimension_numbers<[1], [0], [0], [1], [0, 0, 1, 1], [], []>} : vector<20x4xf32>, vector<4x256xf32>, vector<20x256xf32> -> vector<20x256xf32>
    %29 = vector.extract_strided_slice %28 {offsets = [0, 0], sizes = [8, 256], strides = [1, 1]} : vector<20x256xf32> to vector<8x256xf32>
    %30 = vector.extract_strided_slice %28 {offsets = [8, 0], sizes = [8, 256], strides = [1, 1]} : vector<20x256xf32> to vector<8x256xf32>
    %31 = vector.extract_strided_slice %28 {offsets = [16, 0], sizes = [4, 256], strides = [1, 1]} : vector<20x256xf32> to vector<4x256xf32>
    %cst_17 = arith.constant 0.000000e+00 : f32
    %32 = vector.broadcast %cst_17 : f32 to vector<4x256xf32>
    %cst_18 = arith.constant dense<0.000000e+00> : vector<256x256xf32>
    %33 = tpu.matmul %30, %29, %cst_18 {dimension_numbers = #tpu.dot_dimension_numbers<[0], [0], [1], [1], [0, 1, 1, 1], [], []>} : vector<8x256xf32>, vector<8x256xf32>, vector<256x256xf32> -> vector<256x256xf32>
    %cst_19 = arith.constant dense<0xFF800000> : vector<256xf32>
    %34 = vector.multi_reduction <maximumf>, %33, %cst_19 [1] : vector<256x256xf32> to vector<256xf32>
    %35 = vector.shape_cast %34 : vector<256xf32> to vector<256x1xf32>
    %36 = vector.broadcast %35 : vector<256x1xf32> to vector<256x256xf32>
    %37 = arith.subf %33, %36 : vector<256x256xf32>
    %38 = math.exp %37 : vector<256x256xf32>
    %cst_20 = arith.constant dense<0.000000e+00> : vector<256xf32>
    %39 = vector.multi_reduction <add>, %38, %cst_20 [1] : vector<256x256xf32> to vector<256xf32>
    %40 = vector.shape_cast %39 : vector<256xf32> to vector<256x1xf32>
    %41 = tpu.reciprocal %40 {approx = true} : vector<256x1xf32> -> vector<256x1xf32>
    %42 = vector.broadcast %41 : vector<256x1xf32> to vector<256x256xf32>
    %43 = arith.mulf %38, %42 : vector<256x256xf32>
    %cst_21 = arith.constant dense<0.000000e+00> : vector<4x256xf32>
    %44 = tpu.matmul %31, %43, %cst_21 {dimension_numbers = #tpu.dot_dimension_numbers<[1], [0], [0], [1], [0, 0, 1, 1], [], []>} : vector<4x256xf32>, vector<256x256xf32>, vector<4x256xf32> -> vector<4x256xf32>
    %45 = arith.addf %32, %44 : vector<4x256xf32>
    %46 = arith.addf %26, %45 : vector<4x256xf32>
    %c1_22 = arith.constant 1 : index
    %c0_23 = arith.constant 0 : index
    %c0_24 = arith.constant 0 : index
    %47 = vector.load %arg3[%c1_22, %c0_23, %c0_24] : memref<2x4x256xf32, #tpu.memory_space<vmem>>, vector<1x4x256xf32>
    %48 = vector.shape_cast %47 : vector<1x4x256xf32> to vector<4x256xf32>
    %49 = vector.shape_cast %46 : vector<4x256xf32> to vector<1x4x256xf32>
    tpu.vector_store %arg3[%c1_22, %c0_23, %c0_24], %49 {strides = array<i32>} : memref<2x4x256xf32, #tpu.memory_space<vmem>>, vector<1x4x256xf32>,
    return
  }
  func.func @transform_0(%arg0: i32) -> (i32, i32, i32) {
    %c0_i32 = arith.constant 0 : i32
    %c0_i32_0 = arith.constant 0 : i32
    %c0_i32_1 = arith.constant 0 : i32
    return %arg0, %c0_i32, %c0_i32_0 : i32, i32, i32
  }
  func.func @transform_1(%arg0: i32) -> (i32, i32) {
    %c0_i32 = arith.constant 0 : i32
    %c0_i32_0 = arith.constant 0 : i32
    %c0_i32_1 = arith.constant 0 : i32
    return %c0_i32, %c0_i32_0 : i32, i32
  }
  func.func @transform_2(%arg0: i32) -> (i32, i32, i32) {
    %c0_i32 = arith.constant 0 : i32
    %c0_i32_0 = arith.constant 0 : i32
    %c0_i32_1 = arith.constant 0 : i32
    return %arg0, %c0_i32, %c0_i32_0 : i32, i32, i32
  }
}

</mosaic_0001>

<bundles_post_ra>
// kernel: tpu_custom_call.1
= control target key start
LH: loop header
LB: loop body
LE: loop exit
PB: predicated region body
PF: predicated region fallthrough
CT: control target
= control target key end

     0   :  { %s4186_s0 = inlined_call_operand.vmem [shape: f32[2,4,256], index: 0, kind: input, shape index: {}]   ;;  %s4187_s1 = inlined_call_operand.vmem [shape: f32[20,4], index: 1, kind: input, shape index: {}]   ;;  %s4188_s2 = inlined_call_operand.hbm [shape: f32[2,4,256], index: 2, kind: output, shape index: {}]  }
   0x1   :  { %v2667_v0 = vld [vmem:[%s4186_s0] sm:$0xff] }
   0x2   :  { %4265 = vst [vmem:[#allocation5_spill] sm:$0xff] %v2667_v0 }
   0x3   :  { %17 = vst [vmem:[#allocation1] ss:$2 sm:$0xff] %v2667_v0 }
   0x4   :  { %7 = vsyncpa [#allocation3], 0  ;;  %vm30_vm0 = vcmask 1043456   ;;  %v13_v1 = vld [vmem:[%s4187_s1] sm:$0xff]  ;;  %vm20_vm1 = vcmask 31744   ;;  %v14_v3 = vld [vmem:[%s4187_s1 + $0x8] sm:$0xff] }
   0x5   :  { %v2682_v5 = vld [vmem:[%s4186_s0 + $0x8] sm:$0xff]  ;;  %vm151_vm2 = vcmask 64512   ;;  %s2075_s27 = sshll.u32 %s4188_s2, 4  ;;  %s2647_s28 = smov 128   ;;  %s2076_s27 = int_to_ptr.hbm [resolvable:$true] %s2075_s27 }
   0x6   :  { %4266 = vst [vmem:[#allocation6_spill] sm:$0xff] %v2682_v5  ;;  %s2648_s29 = smov 8  }
   0xa   :  { %v18_v2 = vld.sshfl [vmem:[#allocation1] sm:$0xff pattern:$0x75316420]  ;;  %v19_v4 = vld.sshfl [vmem:[#allocation1 + $0x8] sm:$0xff pattern:$0x75316420] }
   0xb   :  { %2087 = vmatpush.msk.msra.mxu0 %vm30_vm0, %v18_v2  ;;  %2091 = vmatpush.msk.msra.mxu1 %vm30_vm0, %v19_v4  ;;  %1047 = vst [vmem:[#allocation1] ss:$2 sm:$0xff] %v2682_v5 }
   0xc   :  { %2088 = vmatmul.msk.f32.vlgmr.msra.gmra.mxu0 %vm20_vm1, %v13_v1  ;;  %2092 = vmatmul.msk.f32.vlgmr.msra.gmra.mxu1 %vm20_vm1, %v13_v1 }
  0x14   :  { %2089 = vmatmul.msk.f32.gmra.mxu0 %vm20_vm1, %v14_v3  ;;  %2093 = vmatmul.msk.f32.gmra.mxu1 %vm20_vm1, %v14_v3 }
  0x89   :  { %v52_v6 = vpop.f32.mrf.mxu0  ;;  %v78_v8 = vpop.f32.mrf.mxu1 }
  0x8a   :  { %263 = vmatpush.msra.mxu2 %v52_v6  ;;  %376 = vmatpush.msra.mxu3 %v78_v8 }
  0x91   :  { %v55_v7 = vpop.f32.mrf.mxu0  ;;  %v81_v9 = vpop.f32.mrf.mxu1 }
  0x92   :  { %87 = vxpose.xlu0.b32.start.end [1/1] (short) %v55_v7, 128 }
 0x112   :  { %119 = vxpose.xlu0.b32.start.end [1/1] (short) %v81_v9, 128 }
 0x136   :  { %v103_v10 = vpop.trf.xlu0 }
 0x137   :  { %2095 = vmatmul.msk.f32.vlgmr.msra.gmra.mxu2 %vm151_vm2, %v103_v10  ;;  %2127 = vmatmul.msk.f32.vlgmr.msra.gmra.mxu3 %vm151_vm2, %v103_v10 }
 0x13e   :  { %v104_v11 = vpop.trf.xlu0 }
 0x13f   :  { %2096 = vmatmul.msk.f32.gmra.mxu2 %vm151_vm2, %v104_v11  ;;  %2128 = vmatmul.msk.f32.gmra.mxu3 %vm151_vm2, %v104_v11 }
 0x146   :  { %v105_v12 = vpop.trf.xlu0 }
 0x147   :  { %2097 = vmatmul.msk.f32.gmra.mxu2 %vm151_vm2, %v105_v12  ;;  %2129 = vmatmul.msk.f32.gmra.mxu3 %vm151_vm2, %v105_v12 }
 0x14e   :  { %v106_v13 = vpop.trf.xlu0 }
 0x14f   :  { %2098 = vmatmul.msk.f32.gmra.mxu2 %vm151_vm2, %v106_v13  ;;  %2130 = vmatmul.msk.f32.gmra.mxu3 %vm151_vm2, %v106_v13 }
 0x156   :  { %v107_v14 = vpop.trf.xlu0 }
 0x157   :  { %2099 = vmatmul.msk.f32.gmra.mxu2 %vm151_vm2, %v107_v14  ;;  %2131 = vmatmul.msk.f32.gmra.mxu3 %vm151_vm2, %v107_v14 }
 0x15e   :  { %v108_v15 = vpop.trf.xlu0 }
 0x15f   :  { %2100 = vmatmul.msk.f32.gmra.mxu2 %vm151_vm2, %v108_v15  ;;  %2132 = vmatmul.msk.f32.gmra.mxu3 %vm151_vm2, %v108_v15 }
 0x166   :  { %v109_v16 = vpop.trf.xlu0 }
 0x167   :  { %2101 = vmatmul.msk.f32.gmra.mxu2 %vm151_vm2, %v109_v16  ;;  %2133 = vmatmul.msk.f32.gmra.mxu3 %vm151_vm2, %v109_v16 }
 0x16e   :  { %v110_v17 = vpop.trf.xlu0 }
 0x16f   :  { %2102 = vmatmul.msk.f32.gmra.mxu2 %vm151_vm2, %v110_v17  ;;  %2134 = vmatmul.msk.f32.gmra.mxu3 %vm151_vm2, %v110_v17 }
 0x176   :  { %v111_v18 = vpop.trf.xlu0 }
 0x177   :  { %2103 = vmatmul.msk.f32.gmra.mxu2 %vm151_vm2, %v111_v18  ;;  %2135 = vmatmul.msk.f32.gmra.mxu3 %vm151_vm2, %v111_v18 }
 0x17e   :  { %v112_v19 = vpop.trf.xlu0 }
 0x17f   :  { %2104 = vmatmul.msk.f32.gmra.mxu2 %vm151_vm2, %v112_v19  ;;  %2136 = vmatmul.msk.f32.gmra.mxu3 %vm151_vm2, %v112_v19 }
 0x186   :  { %v113_v20 = vpop.trf.xlu0 }
 0x187   :  { %2105 = vmatmul.msk.f32.gmra.mxu2 %vm151_vm2, %v113_v20  ;;  %2137 = vmatmul.msk.f32.gmra.mxu3 %vm151_vm2, %v113_v20 }
 0x18e   :  { %v114_v21 = vpop.trf.xlu0 }
 0x18f   :  { %2106 = vmatmul.msk.f32.gmra.mxu2 %vm151_vm2, %v114_v21  ;;  %2138 = vmatmul.msk.f32.gmra.mxu3 %vm151_vm2, %v114_v21 }
 0x196   :  { %v115_v22 = vpop.trf.xlu0 }
 0x197   :  { %2107 = vmatmul.msk.f32.gmra.mxu2 %vm151_vm2, %v115_v22  ;;  %2139 = vmatmul.msk.f32.gmra.mxu3 %vm151_vm2, %v115_v22 }
 0x19e   :  { %v116_v23 = vpop.trf.xlu0 }
 0x19f   :  { %2108 = vmatmul.msk.f32.gmra.mxu2 %vm151_vm2, %v116_v23  ;;  %2140 = vmatmul.msk.f32.gmra.mxu3 %vm151_vm2, %v116_v23 }
 0x1a6   :  { %v117_v24 = vpop.trf.xlu0 }
 0x1a7   :  { %2109 = vmatmul.msk.f32.gmra.mxu2 %vm151_vm2, %v117_v24  ;;  %2141 = vmatmul.msk.f32.gmra.mxu3 %vm151_vm2, %v117_v24 }
 0x1ae   :  { %v118_v25 = vpop.trf.xlu0 }
 0x1af   :  { %2110 = vmatmul.msk.f32.gmra.mxu2 %vm151_vm2, %v118_v25  ;;  %2142 = vmatmul.msk.f32.gmra.mxu3 %vm151_vm2, %v118_v25 }
 0x1b6   :  { %v135_v26 = vpop.trf.xlu0 }
 0x1b7   :  { %2111 = vmatmul.msk.f32.gmra.mxu2 %vm151_vm2, %v135_v26  ;;  %2143 = vmatmul.msk.f32.gmra.mxu3 %vm151_vm2, %v135_v26 }
 0x1ba   :  { %v2722_v27 = vpop.f32.mrf.mxu2  ;;  %v2724_v28 = vpop.f32.mrf.mxu3 }
 0x1bb   :  { %v474_v29 = vmax.f32 %v2722_v27, %v2724_v28 }
 0x1bd   :  { %475 = vmax.xlane.f32.xlu2 %v474_v29 }
 0x1be   :  { %v136_v30 = vpop.trf.xlu0 }
 0x1bf   :  { %2112 = vmatmul.msk.f32.gmra.mxu2 %vm151_vm2, %v136_v30  ;;  %2144 = vmatmul.msk.f32.gmra.mxu3 %vm151_vm2, %v136_v30 }
 0x1c2   :  { %v2730_v31 = vpop.f32.mrf.mxu2  ;;  %v2732_v32 = vpop.f32.mrf.mxu3 }
 0x1c3   :  { %v477_v33 = vmax.f32 %v2730_v31, %v2732_v32 }
 0x1c5   :  { %478 = vmax.xlane.f32.xlu2 %v477_v33 }
 0x1c6   :  { %v137_v34 = vpop.trf.xlu0 }
 0x1c7   :  { %2113 = vmatmul.msk.f32.gmra.mxu2 %vm151_vm2, %v137_v34  ;;  %2145 = vmatmul.msk.f32.gmra.mxu3 %vm151_vm2, %v137_v34 }
 0x1ca   :  { %v2738_v35 = vpop.f32.mrf.mxu2  ;;  %v2740_v36 = vpop.f32.mrf.mxu3 }
 0x1cb   :  { %v480_v37 = vmax.f32 %v2738_v35, %v2740_v36 }
 0x1cd   :  { %481 = vmax.xlane.f32.xlu2 %v480_v37 }
 0x1ce   :  { %v138_v38 = vpop.trf.xlu0 }
 0x1cf   :  { %2114 = vmatmul.msk.f32.gmra.mxu2 %vm151_vm2, %v138_v38  ;;  %2146 = vmatmul.msk.f32.gmra.mxu3 %vm151_vm2, %v138_v38 }
 0x1d2   :  { %v2746_v39 = vpop.f32.mrf.mxu2  ;;  %v2748_v40 = vpop.f32.mrf.mxu3 }
 0x1d3   :  { %v483_v41 = vmax.f32 %v2746_v39, %v2748_v40 }
 0x1d5   :  { %484 = vmax.xlane.f32.xlu2 %v483_v41 }
 0x1d6   :  { %v139_v42 = vpop.trf.xlu0 }
 0x1d7   :  { %2115 = vmatmul.msk.f32.gmra.mxu2 %vm151_vm2, %v139_v42  ;;  %2147 = vmatmul.msk.f32.gmra.mxu3 %vm151_vm2, %v139_v42 }
 0x1da   :  { %v2754_v43 = vpop.f32.mrf.mxu2  ;;  %v2756_v44 = vpop.f32.mrf.mxu3 }
 0x1db   :  { %v486_v45 = vmax.f32 %v2754_v43, %v2756_v44 }
 0x1dd   :  { %487 = vmax.xlane.f32.xlu2 %v486_v45 }
 0x1de   :  { %v140_v46 = vpop.trf.xlu0 }
 0x1df   :  { %2116 = vmatmul.msk.f32.gmra.mxu2 %vm151_vm2, %v140_v46  ;;  %2148 = vmatmul.msk.f32.gmra.mxu3 %vm151_vm2, %v140_v46 }
 0x1e2   :  { %v2762_v47 = vpop.f32.mrf.mxu2  ;;  %v2764_v48 = vpop.f32.mrf.mxu3 }
 0x1e3   :  { %v489_v49 = vmax.f32 %v2762_v47, %v2764_v48 }
 0x1e5   :  { %490 = vmax.xlane.f32.xlu1 %v489_v49 }
 0x1e6   :  { %v141_v50 = vpop.trf.xlu0 }
 0x1e7   :  { %2117 = vmatmul.msk.f32.gmra.mxu2 %vm151_vm2, %v141_v50  ;;  %2149 = vmatmul.msk.f32.gmra.mxu3 %vm151_vm2, %v141_v50 }
 0x1ea   :  { %v2770_v51 = vpop.f32.mrf.mxu2  ;;  %v2772_v52 = vpop.f32.mrf.mxu3 }
 0x1eb   :  { %v492_v53 = vmax.f32 %v2770_v51, %v2772_v52 }
 0x1ed   :  { %493 = vmax.xlane.f32.xlu2 %v492_v53 }
 0x1ee   :  { %v142_v54 = vpop.trf.xlu0 }
 0x1ef   :  { %2118 = vmatmul.msk.f32.gmra.mxu2 %vm151_vm2, %v142_v54  ;;  %2150 = vmatmul.msk.f32.gmra.mxu3 %vm151_vm2, %v142_v54 }
 0x1f2   :  { %v2778_v55 = vpop.f32.mrf.mxu2  ;;  %v2780_v56 = vpop.f32.mrf.mxu3 }
 0x1f3   :  { %v495_v57 = vmax.f32 %v2778_v55, %v2780_v56 }
 0x1f5   :  { %496 = vmax.xlane.f32.xlu1 %v495_v57 }
 0x1f6   :  { %v143_v58 = vpop.trf.xlu0 }
 0x1f7   :  { %2119 = vmatmul.msk.f32.gmra.mxu2 %vm151_vm2, %v143_v58  ;;  %2151 = vmatmul.msk.f32.gmra.mxu3 %vm151_vm2, %v143_v58 }
 0x1fa   :  { %v2786_v59 = vpop.f32.mrf.mxu2  ;;  %v2788_v60 = vpop.f32.mrf.mxu3 }
 0x1fb   :  { %v498_v61 = vmax.f32 %v2786_v59, %v2788_v60 }
 0x1fd   :  { %499 = vmax.xlane.f32.xlu2 %v498_v61 }
 0x1fe   :  { %v144_v62 = vpop.trf.xlu0 }
 0x1ff   :  { %2120 = vmatmul.msk.f32.gmra.mxu2 %vm151_vm2, %v144_v62  ;;  %2152 = vmatmul.msk.f32.gmra.mxu3 %vm151_vm2, %v144_v62 }
 0x202   :  { %v2794_v63 = vpop.f32.mrf.mxu2  ;;  %v2796_v1 = vpop.f32.mrf.mxu3 }
 0x203   :  { %v501_v2 = vmax.f32 %v2794_v63, %v2796_v1 }
 0x205   :  { %502 = vmax.xlane.f32.xlu1 %v501_v2 }
 0x206   :  { %v145_v3 = vpop.trf.xlu0 }
 0x207   :  { %2121 = vmatmul.msk.f32.gmra.mxu2 %vm151_vm2, %v145_v3  ;;  %2153 = vmatmul.msk.f32.gmra.mxu3 %vm151_vm2, %v145_v3 }
 0x20a   :  { %v2802_v4 = vpop.f32.mrf.mxu2  ;;  %v2804_v6 = vpop.f32.mrf.mxu3 }
 0x20b   :  { %v504_v7 = vmax.f32 %v2802_v4, %v2804_v6 }
 0x20d   :  { %505 = vmax.xlane.f32.xlu2 %v504_v7 }
 0x20e   :  { %v146_v8 = vpop.trf.xlu0 }
 0x20f   :  { %2122 = vmatmul.msk.f32.gmra.mxu2 %vm151_vm2, %v146_v8  ;;  %2154 = vmatmul.msk.f32.gmra.mxu3 %vm151_vm2, %v146_v8 }
 0x212   :  { %v2810_v9 = vpop.f32.mrf.mxu2  ;;  %v2812_v10 = vpop.f32.mrf.mxu3 }
 0x213   :  { %v507_v11 = vmax.f32 %v2810_v9, %v2812_v10 }
 0x215   :  { %508 = vmax.xlane.f32.xlu1 %v507_v11 }
 0x216   :  { %v147_v12 = vpop.trf.xlu0 }
 0x217   :  { %2123 = vmatmul.msk.f32.gmra.mxu2 %vm151_vm2, %v147_v12  ;;  %2155 = vmatmul.msk.f32.gmra.mxu3 %vm151_vm2, %v147_v12 }
 0x21a   :  { %v2818_v13 = vpop.f32.mrf.mxu2  ;;  %v2820_v14 = vpop.f32.mrf.mxu3 }
 0x21b   :  { %v510_v15 = vmax.f32 %v2818_v13, %v2820_v14 }
 0x21d   :  { %511 = vmax.xlane.f32.xlu2 %v510_v15 }
 0x21e   :  { %v148_v16 = vpop.trf.xlu0 }
 0x21f   :  { %2124 = vmatmul.msk.f32.gmra.mxu2 %vm151_vm2, %v148_v16  ;;  %2156 = vmatmul.msk.f32.gmra.mxu3 %vm151_vm2, %v148_v16 }
 0x222   :  { %v2826_v17 = vpop.f32.mrf.mxu2  ;;  %v2828_v18 = vpop.f32.mrf.mxu3 }
 0x223   :  { %v513_v19 = vmax.f32 %v2826_v17, %v2828_v18 }
 0x225   :  { %514 = vmax.xlane.f32.xlu2 %v513_v19 }
 0x226   :  { %v149_v23 = vpop.trf.xlu0 }
 0x227   :  { %2125 = vmatmul.msk.f32.gmra.mxu2 %vm151_vm2, %v149_v23  ;;  %2157 = vmatmul.msk.f32.gmra.mxu3 %vm151_vm2, %v149_v23 }
 0x22a   :  { %v2832_v20 = vpop.f32.mrf.mxu2  ;;  %v2834_v21 = vpop.f32.mrf.mxu3 }
 0x22b   :  { %v516_v22 = vmax.f32 %v2832_v20, %v2834_v21 }
 0x22d   :  { %517 = vmax.xlane.f32.xlu1 %v516_v22 }
 0x22e   :  { %v150_v29 = vpop.trf.xlu0 }
 0x22f   :  { %2126 = vmatmul.msk.f32.gmra.mxu2 %vm151_vm2, %v150_v29  ;;  %2158 = vmatmul.msk.f32.gmra.mxu3 %vm151_vm2, %v150_v29 }
 0x230   :  { %v2860_v42 = vpop.xlane.xlu2 %475 }
 0x232   :  { %v2840_v24 = vpop.f32.mrf.mxu2  ;;  %v2842_v25 = vpop.f32.mrf.mxu3 }
 0x233   :  { %v519_v26 = vmax.f32 %v2840_v24, %v2842_v25 }
 0x235   :  { %520 = vmax.xlane.f32.xlu1 %v519_v26 }
 0x238   :  { %v2868_v50 = vpop.xlane.xlu2 %478 }
 0x23a   :  { %v2848_v30 = vpop.f32.mrf.mxu2  ;;  %v2850_v33 = vpop.f32.mrf.mxu3 }
 0x23b   :  { %4267 = vst [vmem:[#allocation7_spill] sm:$0xff] %v2848_v30  ;;  %v522_v34 = vmax.f32 %v2848_v30, %v2850_v33 }
 0x23c   :  { %4268 = vst [vmem:[#allocation8_spill] sm:$0xff] %v2850_v33 }
 0x23d   :  { %523 = vmax.xlane.f32.xlu2 %v522_v34 }
 0x240   :  { %v2882_v2 = vpop.xlane.xlu2 %481 }
 0x242   :  { %v2854_v37 = vpop.f32.mrf.mxu2  ;;  %v2856_v38 = vpop.f32.mrf.mxu3 }
 0x243   :  { %4269 = vst [vmem:[#allocation9_spill] sm:$0xff] %v2854_v37  ;;  %v525_v41 = vmax.f32 %v2854_v37, %v2856_v38 }
 0x244   :  { %4270 = vst [vmem:[#allocation10_spill] sm:$0xff] %v2856_v38 }
 0x245   :  { %526 = vmax.xlane.f32.xlu1 %v525_v41 }
 0x248   :  { %v2890_v11 = vpop.xlane.xlu2 %484 }
 0x24a   :  { %v2862_v45 = vpop.f32.mrf.mxu2  ;;  %v2864_v46 = vpop.f32.mrf.mxu3 }
 0x24b   :  { %4271 = vst [vmem:[#allocation11_spill] sm:$0xff] %v2862_v45  ;;  %v528_v49 = vmax.f32 %v2862_v45, %v2864_v46 }
 0x24c   :  { %4272 = vst [vmem:[#allocation12_spill] sm:$0xff] %v2864_v46 }
 0x24d   :  { %529 = vmax.xlane.f32.xlu2 %v528_v49 }
 0x250   :  { %v2898_v19 = vpop.xlane.xlu2 %487 }
 0x252   :  { %v2870_v53 = vpop.f32.mrf.mxu2  ;;  %v2872_v54 = vpop.f32.mrf.mxu3 }
 0x253   :  { %4273 = vst [vmem:[#allocation13_spill] sm:$0xff] %v2870_v53  ;;  %v531_v57 = vmax.f32 %v2870_v53, %v2872_v54 }
 0x254   :  { %4274 = vst [vmem:[#allocation14_spill] sm:$0xff] %v2872_v54 }
 0x255   :  { %532 = vmax.xlane.f32.xlu1 %v531_v57 }
 0x258   :  { %v2900_v22 = vpop.xlane.xlu1 %490 }
 0x25a   :  { %v2876_v58 = vpop.f32.mrf.mxu2  ;;  %v2878_v61 = vpop.f32.mrf.mxu3 }
 0x25b   :  { %4275 = vst [vmem:[#allocation15_spill] sm:$0xff] %v2878_v61  ;;  %v534_v62 = vmax.f32 %v2876_v58, %v2878_v61 }
 0x25d   :  { %535 = vmax.xlane.f32.xlu2 %v534_v62 }
 0x260   :  { %v2908_v34 = vpop.xlane.xlu2 %493 }
 0x262   :  { %v2884_v3 = vpop.f32.mrf.mxu2  ;;  %v2886_v7 = vpop.f32.mrf.mxu3 }
 0x263   :  { %4276 = vst [vmem:[#allocation16_spill] sm:$0xff] %v2884_v3  ;;  %v537_v8 = vmax.f32 %v2884_v3, %v2886_v7 }
 0x264   :  { %4277 = vst [vmem:[#allocation17_spill] sm:$0xff] %v2886_v7 }
 0x265   :  { %538 = vmax.xlane.f32.xlu1 %v537_v8 }
 0x268   :  { %v497_v41 = vpop.xlane.xlu1 %496 }
 0x26a   :  { %v2892_v12 = vpop.f32.mrf.mxu2  ;;  %v2894_v15 = vpop.f32.mrf.mxu3 }
 0x26b   :  { %v540_v16 = vmax.f32 %v2892_v12, %v2894_v15 }
 0x26d   :  { %541 = vmax.xlane.f32.xlu2 %v540_v16 }
 0x270   :  { %v2916_v8 = vpop.xlane.xlu2 %499 }
 0x272   :  { %v2902_v23 = vpop.f32.mrf.mxu2  ;;  %v2904_v26 = vpop.f32.mrf.mxu3 }
 0x273   :  { %4278 = vst [vmem:[#allocation18_spill] sm:$0xff] %v2902_v23  ;;  %v543_v29 = vmax.f32 %v2902_v23, %v2904_v26 }
 0x274   :  { %4279 = vst [vmem:[#allocation19_spill] sm:$0xff] %v2904_v26 }
 0x275   :  { %544 = vmax.xlane.f32.xlu1 %v543_v29 }
 0x278   :  { %v503_v16 = vpop.xlane.xlu1 %502 }
 0x279   :  { %v588_v3 = vsub.f32 %v2794_v63, %v503_v16  ;;  %v584_v63 = vsub.f32 %v2778_v55, %v497_v41 }
 0x27a   :  { %v2910_v49 = vpop.f32.mrf.mxu2  ;;  %v2912_v57 = vpop.f32.mrf.mxu3 }
 0x27b   :  { %v546_v62 = vmax.f32 %v2910_v49, %v2912_v57  ;;  %v670_v30 = vmul.f32 1.442695, %v588_v3  ;;  %v662_v3 = vmul.f32 1.442695, %v584_v63 }
 0x27d   :  { %547 = vmax.xlane.f32.xlu2 %v546_v62 }
 0x280   :  { %v2924_v38 = vpop.xlane.xlu2 %505 }
 0x282   :  { %v2918_v5 = vpop.f32.mrf.mxu2  ;;  %v2920_v0 = vpop.f32.mrf.mxu3 }
 0x283   :  { %v549_v29 = vmax.f32 %v2918_v5, %v2920_v0 }
 0x285   :  { %550 = vmax.xlane.f32.xlu1 %v549_v29  ;;  %v589_v29 = vsub.f32 %v2796_v1, %v503_v16  ;;  %v585_v1 = vsub.f32 %v2780_v56, %v497_v41  ;;  %v580_v56 = vsub.f32 %v2762_v47, %v2900_v22 }
 0x288   :  { %v509_v37 = vpop.xlane.xlu1 %508 }
 0x289   :  { %v592_v54 = vsub.f32 %v2810_v9, %v509_v37  ;;  %v593_v53 = vsub.f32 %v2812_v10, %v509_v37  ;;  %v672_v9 = vmul.f32 1.442695, %v589_v29 }
 0x28a   :  { %v2928_v7 = vpop.f32.mrf.mxu2  ;;  %v2930_v62 = vpop.f32.mrf.mxu3 }
 0x28b   :  { %v678_v26 = vmul.f32 1.442695, %v592_v54  ;;  %v680_v23 = vmul.f32 1.442695, %v593_v53  ;;  %v552_v33 = vmax.f32 %v2928_v7, %v2930_v62 }
 0x28d   :  { %2236 = vpow2.f32 %v678_v26  ;;  %553 = vmax.xlane.f32.xlu2 %v552_v33 }
 0x28e   :  { %2238 = vpow2.f32 %v680_v23  ;;  %v664_v23 = vmul.f32 1.442695, %v585_v1 }
 0x28f   :  { %2240 = vpow2.f32 %v670_v30 }
 0x290   :  { %v512_v46 = vpop.xlane.xlu2 %511  ;;  %2242 = vpow2.f32 %v672_v9 }
 0x291   :  { %v594_v55 = vsub.f32 %v2818_v13, %v512_v46  ;;  %v595_v41 = vsub.f32 %v2820_v14, %v512_v46  ;;  %2244 = vpow2.f32 %v662_v3  ;;  %v654_v46 = vmul.f32 1.442695, %v580_v56 }
 0x292   :  { %v2936_v10 = vpop.f32.mrf.mxu2  ;;  %v2938_v37 = vpop.f32.mrf.mxu3  ;;  %2246 = vpow2.f32 %v664_v23 }
 0x293   :  { %v2940_v45 = vpop.eup %2236  ;;  %v555_v53 = vmax.f32 %v2936_v10, %v2938_v37  ;;  %v684_v14 = vmul.f32 1.442695, %v595_v41 }
 0x294   :  { %v2945_v54 = vpop.eup %2238 }
 0x295   :  { %556 = vmax.xlane.f32.xlu1 %v555_v53  ;;  %v795_v33 = vadd.f32 %v2945_v54, %v2940_v45  ;;  %v2950_v16 = vpop.eup %2240 }
 0x296   :  { %v2955_v61 = vpop.eup %2242 }
 0x297   :  { %796 = vadd.xlane.f32.xlu2 %v795_v33  ;;  %v789_v47 = vadd.f32 %v2955_v61, %v2950_v16 }
 0x298   :  { %v515_v26 = vpop.xlane.xlu2 %514 }
 0x299   :  { %v596_v30 = vsub.f32 %v2826_v17, %v515_v26  ;;  %v597_v29 = vsub.f32 %v2828_v18, %v515_v26  ;;  %v581_v17 = vsub.f32 %v2764_v48, %v2900_v22  ;;  %v682_v18 = vmul.f32 1.442695, %v594_v55  ;;  %v2970_v26 = vpop.eup %2244 }
 0x29a   :  { %v2960_v9 = vpop.f32.mrf.mxu2  ;;  %v2962_v63 = vpop.f32.mrf.mxu3  ;;  %v591_v22 = vsub.f32 %v2804_v6, %v2924_v38 }
 0x29b   :  { %v686_v53 = vmul.f32 1.442695, %v596_v30  ;;  %v688_v1 = vmul.f32 1.442695, %v597_v29  ;;  %v558_v13 = vmax.f32 %v2960_v9, %v2962_v63  ;;  %v656_v33 = vmul.f32 1.442695, %v581_v17  ;;  %v2974_v48 = vpop.eup %2246 }
 0x29c   :  { %v590_v30 = vsub.f32 %v2802_v4, %v2924_v38  ;;  %v783_v38 = vadd.f32 %v2974_v48, %v2970_v26 }
 0x29d   :  { %2248 = vpow2.f32 %v686_v53  ;;  %559 = vmax.xlane.f32.xlu1 %v558_v13  ;;  %v676_v13 = vmul.f32 1.442695, %v591_v22 }
 0x29e   :  { %2250 = vpow2.f32 %v688_v1  ;;  %v674_v1 = vmul.f32 1.442695, %v590_v30 }
 0x29f   :  { %790 = vadd.xlane.f32.xlu2 %v789_v47  ;;  %2252 = vpow2.f32 %v682_v18 }
 0x2a0   :  { %v518_v3 = vpop.xlane.xlu1 %517  ;;  %2254 = vpow2.f32 %v684_v14 }
 0x2a1   :  { %2256 = vpow2.f32 %v654_v46  ;;  %v598_v56 = vsub.f32 %v2832_v20, %v518_v3  ;;  %v599_v53 = vsub.f32 %v2834_v21, %v518_v3  ;;  %v586_v21 = vsub.f32 %v2786_v59, %v2916_v8 }
 0x2a2   :  { %v2978_v23 = vpop.f32.mrf.mxu2  ;;  %v2980_v55 = vpop.f32.mrf.mxu3  ;;  %2258 = vpow2.f32 %v656_v33  ;;  %v587_v33 = vsub.f32 %v2788_v60, %v2916_v8  ;;  %v582_v60 = vsub.f32 %v2770_v51, %v2908_v34 }
 0x2a3   :  { %v2982_v29 = vpop.eup %2248  ;;  %v561_v41 = vmax.f32 %v2978_v23, %v2980_v55  ;;  %v690_v20 = vmul.f32 1.442695, %v598_v56  ;;  %v692_v47 = vmul.f32 1.442695, %v599_v53  ;;  %2260 = vpow2.f32 %v674_v1 }
 0x2a4   :  { %v2987_v4 = vpop.eup %2250  ;;  %2262 = vpow2.f32 %v676_v13  ;;  %v666_v30 = vmul.f32 1.442695, %v586_v21  ;;  %v668_v56 = vmul.f32 1.442695, %v587_v33  ;;  %v583_v1 = vsub.f32 %v2772_v52, %v2908_v34 }
 0x2a5   :  { %562 = vmax.xlane.f32.xlu1 %v561_v41  ;;  %v801_v6 = vadd.f32 %v2987_v4, %v2982_v29  ;;  %v2994_v17 = vpop.eup %2252  ;;  %2264 = vpow2.f32 %v690_v20  ;;  %v578_v21 = vsub.f32 %v2754_v43, %v2898_v19  ;;  %v579_v52 = vsub.f32 %v2756_v44, %v2898_v19 }
 0x2a6   :  { %v2996_v18 = vpop.eup %2254  ;;  %2266 = vpow2.f32 %v692_v47  ;;  %v660_v20 = vmul.f32 1.442695, %v583_v1 }
 0x2a7   :  { %802 = vadd.xlane.f32.xlu0 %v801_v6  ;;  %784 = vadd.xlane.f32.xlu2 %v783_v38  ;;  %v2998_v14 = vpop.eup %2256  ;;  %v798_v3 = vadd.f32 %v2996_v18, %v2994_v17  ;;  %2268 = vpow2.f32 %v666_v30  ;;  %v658_v38 = vmul.f32 1.442695, %v582_v60  ;;  %v650_v33 = vmul.f32 1.442695, %v578_v21 }
 0x2a8   :  { %v3002_v46 = vpop.eup %2258  ;;  %2270 = vpow2.f32 %v668_v56 }
 0x2a9   :  { %4280 = vst [vmem:[#allocation20_spill] sm:$0xff] %v3002_v46  ;;  %v777_v22 = vadd.f32 %v3002_v46, %v2998_v14  ;;  %v3010_v41 = vpop.eup %2260  ;;  %2272 = vpow2.f32 %v658_v38  ;;  %v576_v38 = vsub.f32 %v2746_v39, %v2890_v11  ;;  %v574_v39 = vsub.f32 %v2738_v35, %v2882_v2 }
 0x2aa   :  { %v3012_v59 = vpop.eup %2262  ;;  %2274 = vpow2.f32 %v660_v20  ;;  %v3048_v60 = vpop.f32.mrf.mxu2  ;;  %v577_v20 = vsub.f32 %v2748_v40, %v2890_v11  ;;  %v575_v40 = vsub.f32 %v2740_v36, %v2882_v2  ;;  %v572_v35 = vsub.f32 %v2730_v31, %v2868_v50 }
 0x2ab   :  { %v3014_v53 = vpop.eup %2264  ;;  %v792_v6 = vadd.f32 %v3012_v59, %v3010_v41  ;;  %2276 = vpow2.f32 %v650_v33  ;;  %v3050_v1 = vpop.f32.mrf.mxu3  ;;  %v646_v21 = vmul.f32 1.442695, %v576_v38  ;;  %v642_v11 = vmul.f32 1.442695, %v574_v39 }
 0x2ac   :  { %v3018_v8 = vpop.eup %2266  ;;  %v644_v38 = vmul.f32 1.442695, %v575_v40  ;;  %v638_v2 = vmul.f32 1.442695, %v572_v35 }
 0x2ad   :  { %799 = vadd.xlane.f32.xlu1 %v798_v3  ;;  %v804_v13 = vadd.f32 %v3018_v8, %v3014_v53  ;;  %v3026_v47 = vpop.eup %2268  ;;  %v652_v3 = vmul.f32 1.442695, %v579_v52 }
 0x2ae   :  { %v3028_v51 = vpop.eup %2270 }
 0x2af   :  { %778 = vadd.xlane.f32.xlu2 %v777_v22  ;;  %v786_v34 = vadd.f32 %v3028_v51, %v3026_v47  ;;  %v3036_v30 = vpop.eup %2272  ;;  %2278 = vpow2.f32 %v652_v3 }
 0x2b0   :  { %v3038_v22 = vpop.eup %2274  ;;  %v3058_v52 = vpop.xlane.xlu2 %523  ;;  %2280 = vpow2.f32 %v646_v21  ;;  %v573_v21 = vsub.f32 %v2732_v32, %v2868_v50 }
 0x2b1   :  { %v780_v43 = vadd.f32 %v3038_v22, %v3036_v30  ;;  %v3042_v56 = vpop.eup %2276 }
 0x2b2   :  { %4281 = vst [vmem:[#allocation21_spill] sm:$0xff] %v3042_v56  ;;  %v3060_v33 = vpop.f32.mrf.mxu2 }
 0x2b3   :  { %v3062_v3 = vpop.f32.mrf.mxu3 }
 0x2b5   :  { %793 = vadd.xlane.f32.xlu1 %v792_v6  ;;  %v3044_v44 = vpop.eup %2278  ;;  %v521_v6 = vpop.xlane.xlu1 %520 }
 0x2b6   :  { %4282 = vst [vmem:[#allocation22_spill] sm:$0xff] %v3044_v44  ;;  %v774_v19 = vadd.f32 %v3044_v44, %v3042_v56  ;;  %v600_v31 = vsub.f32 %v2840_v24, %v521_v6  ;;  %v601_v32 = vsub.f32 %v2842_v25, %v521_v6  ;;  %v570_v24 = vsub.f32 %v2722_v27, %v2860_v42 }
 0x2b7   :  { %805 = vadd.xlane.f32.xlu2 %v804_v13  ;;  %v564_v13 = vmax.f32 %v3048_v60, %v3050_v1  ;;  %v571_v25 = vsub.f32 %v2724_v28, %v2860_v42 }
 0x2bd   :  { %787 = vadd.xlane.f32.xlu1 %v786_v34  ;;  %v648_v34 = vmul.f32 1.442695, %v577_v20  ;;  %v3074_v20 = vpop.eup %2280 }
 0x2bf   :  { %2282 = vpow2.f32 %v648_v34  ;;  %v640_v34 = vmul.f32 1.442695, %v573_v21 }
 0x2c0   :  { %2284 = vpow2.f32 %v642_v11  ;;  %v694_v11 = vmul.f32 1.442695, %v600_v31 }
 0x2c1   :  { %2286 = vpow2.f32 %v644_v38  ;;  %v696_v38 = vmul.f32 1.442695, %v601_v32 }
 0x2c2   :  { %2288 = vpow2.f32 %v638_v2  ;;  %v634_v2 = vmul.f32 1.442695, %v570_v24 }
 0x2c3   :  { %2290 = vpow2.f32 %v640_v34  ;;  %v636_v34 = vmul.f32 1.442695, %v571_v25 }
 0x2c4   :  { %2292 = vpow2.f32 %v694_v11 }
 0x2c5   :  { %781 = vadd.xlane.f32.xlu1 %v780_v43  ;;  %v3064_v43 = vpop.xlane.xlu1 %526  ;;  %v3076_v44 = vpop.eup %2282  ;;  %2294 = vpow2.f32 %v696_v38 }
 0x2c6   :  { %4283 = vst [vmem:[#allocation23_spill] sm:$0xff] %v3076_v44  ;;  %v771_v36 = vadd.f32 %v3076_v44, %v3074_v20  ;;  %2296 = vpow2.f32 %v634_v2 }
 0x2c7   :  { %2298 = vpow2.f32 %v636_v34 }
 0x2cd   :  { %775 = vadd.xlane.f32.xlu1 %v774_v19  ;;  %v567_v19 = vmax.f32 %v3060_v33, %v3062_v3  ;;  %v3078_v56 = vpop.xlane.xlu1 %532 }
 0x2d5   :  { %565 = vmax.xlane.f32.xlu1 %v564_v13  ;;  %v3072_v13 = vpop.xlane.xlu2 %529 }
 0x2d8   :  { %v3092_v46 = vpop.xlane.xlu1 %538 }
 0x2dd   :  { %568 = vmax.xlane.f32.xlu1 %v567_v19  ;;  %v3086_v39 = vpop.xlane.xlu2 %535  ;;  %v3088_v19 = vpop.eup %2284 }
 0x2de   :  { %v3090_v40 = vpop.eup %2286 }
 0x2df   :  { %4284 = vst [vmem:[#allocation24_spill] sm:$0xff] %v3090_v40  ;;  %v768_v50 = vadd.f32 %v3090_v40, %v3088_v19  ;;  %v3100_v21 = vpop.eup %2288 }
 0x2e5   :  { %772 = vadd.xlane.f32.xlu1 %v771_v36  ;;  %v3098_v35 = vpop.xlane.xlu2 %541  ;;  %v3102_v36 = vpop.eup %2290 }
 0x2e6   :  { %4285 = vst [vmem:[#allocation25_spill] sm:$0xff] %v3102_v36  ;;  %v765_v6 = vadd.f32 %v3102_v36, %v3100_v21  ;;  %v3112_v32 = vpop.eup %2292 }
 0x2e8   :  { %v3104_v44 = vpop.xlane.xlu1 %544 }
 0x2ed   :  { %769 = vadd.xlane.f32.xlu1 %v768_v50  ;;  %v3114_v50 = vpop.eup %2294 }
 0x2ee   :  { %v807_v25 = vadd.f32 %v3114_v50, %v3112_v32 }
 0x2f0   :  { %v548_v31 = vpop.xlane.xlu2 %547 }
 0x2f1   :  { %v618_v27 = vsub.f32 %v2910_v49, %v548_v31  ;;  %v619_v42 = vsub.f32 %v2912_v57, %v548_v31 }
 0x2f3   :  { %v730_v36 = vmul.f32 1.442695, %v618_v27 }
 0x2f5   :  { %766 = vadd.xlane.f32.xlu1 %v765_v6  ;;  %v15_v6 = vld [vmem:[%s4187_s1 + $0x10] sm:$0xf] }
 0x2f6   :  { %2090 = vmatmul.msk.f32.gmra.mxu0 %vm20_vm1, %v15_v6  ;;  %2094 = vmatmul.msk.f32.gmra.mxu1 %vm20_vm1, %v15_v6  ;;  %v615_v6 = vsub.f32 %v2894_v15, %v3098_v35 }
 0x2f8   :  { %v551_v40 = vpop.xlane.xlu1 %550 }
 0x2f9   :  { %v620_v11 = vsub.f32 %v2918_v5, %v551_v40  ;;  %v621_v28 = vsub.f32 %v2920_v0, %v551_v40  ;;  %v732_v5 = vmul.f32 1.442695, %v619_v42  ;;  %v3127_v0 = vpop.eup %2296 }
 0x2fa   :  { %v3129_v49 = vpop.eup %2298 }
 0x2fb   :  { %v734_v38 = vmul.f32 1.442695, %v620_v11  ;;  %v736_v24 = vmul.f32 1.442695, %v621_v28  ;;  %v762_v31 = vadd.f32 %v3129_v49, %v3127_v0 }
 0x2fd   :  { %2300 = vpow2.f32 %v734_v38  ;;  %808 = vadd.xlane.f32.xlu1 %v807_v25 }
 0x2fe   :  { %2302 = vpow2.f32 %v736_v24 }
 0x2ff   :  { %2304 = vpow2.f32 %v730_v36 }
 0x300   :  { %v554_v57 = vpop.xlane.xlu2 %553  ;;  %2306 = vpow2.f32 %v732_v5 }
 0x301   :  { %v622_v40 = vsub.f32 %v2928_v7, %v554_v57  ;;  %v623_v2 = vsub.f32 %v2930_v62, %v554_v57  ;;  %v614_v62 = vsub.f32 %v2892_v12, %v3098_v35 }
 0x303   :  { %v3133_v34 = vpop.eup %2300  ;;  %v738_v11 = vmul.f32 1.442695, %v622_v40  ;;  %v740_v42 = vmul.f32 1.442695, %v623_v2  ;;  %v722_v2 = vmul.f32 1.442695, %v614_v62 }
 0x304   :  { %4286 = vst [vmem:[#allocation26_spill] sm:$0xff] %v3133_v34  ;;  %v3137_v27 = vpop.eup %2302 }
 0x305   :  { %4287 = vst [vmem:[#allocation27_spill] sm:$0xff] %v3137_v27  ;;  %763 = vadd.xlane.f32.xlu1 %v762_v31  ;;  %v837_v28 = vadd.f32 %v3137_v27, %v3133_v34  ;;  %v3141_v38 = vpop.eup %2304  ;;  %2308 = vpow2.f32 %v738_v11  ;;  %v724_v31 = vmul.f32 1.442695, %v615_v6 }
 0x306   :  { %4288 = vst [vmem:[#allocation28_spill] sm:$0xff] %v3141_v38  ;;  %v3143_v7 = vpop.eup %2306  ;;  %2310 = vpow2.f32 %v740_v42 }
 0x307   :  { %838 = vadd.xlane.f32.xlu2 %v837_v28  ;;  %4289 = vst [vmem:[#allocation29_spill] sm:$0xff] %v3143_v7  ;;  %v834_v40 = vadd.f32 %v3143_v7, %v3141_v38  ;;  %v4292_v28 = vld [vmem:[#allocation15_spill] sm:$0xff] }
 0x308   :  { %v557_v36 = vpop.xlane.xlu1 %556  ;;  %v611_v42 = vsub.f32 %v4292_v28, %v3086_v39 }
 0x309   :  { %v624_v24 = vsub.f32 %v2936_v10, %v557_v36  ;;  %v625_v25 = vsub.f32 %v2938_v37, %v557_v36  ;;  %v610_v37 = vsub.f32 %v2876_v58, %v3086_v39 }
 0x30b   :  { %v742_v5 = vmul.f32 1.442695, %v624_v24  ;;  %v744_v57 = vmul.f32 1.442695, %v625_v25  ;;  %v3153_v12 = vpop.eup %2308 }
 0x30c   :  { %4290 = vst [vmem:[#allocation30_spill] sm:$0xff] %v3153_v12  ;;  %v3155_v11 = vpop.eup %2310 }
 0x30d   :  { %2312 = vpow2.f32 %v742_v5  ;;  %835 = vadd.xlane.f32.xlu1 %v834_v40  ;;  %4291 = vst [vmem:[#allocation31_spill] sm:$0xff] %v3155_v11  ;;  %v840_v25 = vadd.f32 %v3155_v11, %v3153_v12  ;;  %v714_v5 = vmul.f32 1.442695, %v610_v37  ;;  %v4296_v40 = vld [vmem:[#allocation11_spill] sm:$0xff]  ;;  %v4297_v37 = vld [vmem:[#allocation12_spill] sm:$0xff]  ;;  %v4315_v12 = vld [vmem:[#allocation10_spill] sm:$0xff] }
 0x30e   :  { %2314 = vpow2.f32 %v744_v57 }
 0x30f   :  { %2316 = vpow2.f32 %v722_v2  ;;  %v606_v2 = vsub.f32 %v4296_v40, %v3072_v13  ;;  %v4301_v40 = vld [vmem:[#allocation8_spill] sm:$0xff] }
 0x310   :  { %v560_v10 = vpop.xlane.xlu1 %559  ;;  %2318 = vpow2.f32 %v724_v31 }
 0x311   :  { %v626_v15 = vsub.f32 %v2960_v9, %v560_v10  ;;  %v627_v35 = vsub.f32 %v2962_v63, %v560_v10  ;;  %v716_v9 = vmul.f32 1.442695, %v611_v42 }
 0x313   :  { %v3163_v36 = vpop.eup %2312  ;;  %v746_v62 = vmul.f32 1.442695, %v626_v15  ;;  %v748_v24 = vmul.f32 1.442695, %v627_v35  ;;  %v607_v15 = vsub.f32 %v4297_v37, %v3072_v13 }
 0x314   :  { %v3167_v6 = vpop.eup %2314 }
 0x315   :  { %4293 = vst [vmem:[#allocation15_spill] sm:$0xff] %v3167_v6  ;;  %2320 = vpow2.f32 %v746_v62  ;;  %841 = vadd.xlane.f32.xlu1 %v840_v25  ;;  %v843_v58 = vadd.f32 %v3167_v6, %v3163_v36  ;;  %v3171_v63 = vpop.eup %2316  ;;  %v706_v25 = vmul.f32 1.442695, %v606_v2  ;;  %v603_v2 = vsub.f32 %v4301_v40, %v3058_v52 }
 0x316   :  { %2322 = vpow2.f32 %v748_v24  ;;  %4294 = vst [vmem:[#allocation32_spill] sm:$0xff] %v3171_v63  ;;  %v3173_v39 = vpop.eup %2318 }
 0x317   :  { %844 = vadd.xlane.f32.xlu2 %v843_v58  ;;  %4295 = vst [vmem:[#allocation33_spill] sm:$0xff] %v3173_v39  ;;  %2324 = vpow2.f32 %v714_v5  ;;  %v828_v62 = vadd.f32 %v3173_v39, %v3171_v63  ;;  %v4306_v39 = vld [vmem:[#allocation18_spill] sm:$0xff] }
 0x318   :  { %v563_v57 = vpop.xlane.xlu1 %562  ;;  %2326 = vpow2.f32 %v716_v9  ;;  %v4300_v9 = vld [vmem:[#allocation7_spill] sm:$0xff]  ;;  %v616_v63 = vsub.f32 %v4306_v39, %v3104_v44 }
 0x319   :  { %v628_v31 = vsub.f32 %v2978_v23, %v563_v57  ;;  %v629_v10 = vsub.f32 %v2980_v55, %v563_v57  ;;  %v708_v55 = vmul.f32 1.442695, %v607_v15  ;;  %v602_v57 = vsub.f32 %v4300_v9, %v3058_v52 }
 0x31b   :  { %v3181_v35 = vpop.eup %2320  ;;  %v750_v28 = vmul.f32 1.442695, %v628_v31  ;;  %v752_v42 = vmul.f32 1.442695, %v629_v10  ;;  %v698_v15 = vmul.f32 1.442695, %v602_v57 }
 0x31c   :  { %v3185_v24 = vpop.eup %2322 }
 0x31d   :  { %2328 = vpow2.f32 %v750_v28  ;;  %829 = vadd.xlane.f32.xlu1 %v828_v62  ;;  %v846_v23 = vadd.f32 %v3185_v24, %v3181_v35  ;;  %v3189_v5 = vpop.eup %2324 }
 0x31e   :  { %2330 = vpow2.f32 %v752_v42  ;;  %4298 = vst [vmem:[#allocation11_spill] sm:$0xff] %v3189_v5  ;;  %v3191_v13 = vpop.eup %2326  ;;  %v700_v42 = vmul.f32 1.442695, %v603_v2 }
 0x31f   :  { %847 = vadd.xlane.f32.xlu2 %v846_v23  ;;  %4299 = vst [vmem:[#allocation12_spill] sm:$0xff] %v3191_v13  ;;  %2332 = vpow2.f32 %v706_v25  ;;  %v822_v10 = vadd.f32 %v3191_v13, %v3189_v5 }
 0x320   :  { %v3193_v58 = vpop.xlane.xlu1 %799  ;;  %2334 = vpow2.f32 %v708_v55 }
 0x321   :  { %2336 = vpow2.f32 %v698_v15  ;;  %v3227_v15 = vpop.xlane.xlu2 %796 }
 0x322   :  { %2338 = vpow2.f32 %v700_v42 }
 0x323   :  { %v3199_v31 = vpop.eup %2328 }
 0x324   :  { %v3203_v37 = vpop.eup %2330 }
 0x325   :  { %823 = vadd.xlane.f32.xlu1 %v822_v10  ;;  %v849_v28 = vadd.f32 %v3203_v37, %v3199_v31  ;;  %v3207_v62 = vpop.eup %2332 }
 0x326   :  { %4302 = vst [vmem:[#allocation7_spill] sm:$0xff] %v3207_v62  ;;  %v3209_v25 = vpop.eup %2334 }
 0x327   :  { %850 = vadd.xlane.f32.xlu2 %v849_v28  ;;  %4303 = vst [vmem:[#allocation8_spill] sm:$0xff] %v3209_v25  ;;  %v816_v23 = vadd.f32 %v3209_v25, %v3207_v62  ;;  %v3215_v55 = vpop.eup %2336 }
 0x328   :  { %v3211_v52 = vpop.xlane.xlu1 %793  ;;  %4304 = vst [vmem:[#allocation34_spill] sm:$0xff] %v3215_v55  ;;  %v3217_v9 = vpop.eup %2338 }
 0x329   :  { %4305 = vst [vmem:[#allocation35_spill] sm:$0xff] %v3217_v9  ;;  %v810_v40 = vadd.f32 %v3217_v9, %v3215_v55  ;;  %v3231_v13 = vpop.xlane.xlu2 %790 }
 0x32d   :  { %817 = vadd.xlane.f32.xlu1 %v816_v23 }
 0x330   :  { %v3219_v57 = vpop.xlane.xlu1 %787 }
 0x335   :  { %811 = vadd.xlane.f32.xlu1 %v810_v40 }
 0x338   :  { %v3223_v2 = vpop.xlane.xlu1 %781 }
 0x340   :  { %v3225_v10 = vpop.xlane.xlu1 %775 }
 0x348   :  { %v566_v28 = vpop.xlane.xlu1 %565 }
 0x349   :  { %v630_v42 = vsub.f32 %v3048_v60, %v566_v28  ;;  %v631_v23 = vsub.f32 %v3050_v1, %v566_v28  ;;  %v4307_v1 = vld [vmem:[#allocation19_spill] sm:$0xff]  ;;  %v3247_v28 = vpop.xlane.xlu2 %784 }
 0x34b   :  { %v754_v25 = vmul.f32 1.442695, %v630_v42  ;;  %v756_v62 = vmul.f32 1.442695, %v631_v23 }
 0x34d   :  { %2340 = vpow2.f32 %v754_v25  ;;  %v617_v25 = vsub.f32 %v4307_v1, %v3104_v44  ;;  %v4309_v44 = vld [vmem:[#allocation17_spill] sm:$0xff] }
 0x34e   :  { %2342 = vpow2.f32 %v756_v62 }
 0x350   :  { %v569_v5 = vpop.xlane.xlu1 %568 }
 0x351   :  { %v632_v40 = vsub.f32 %v3060_v33, %v569_v5  ;;  %v633_v9 = vsub.f32 %v3062_v3, %v569_v5  ;;  %v726_v33 = vmul.f32 1.442695, %v616_v63  ;;  %v728_v3 = vmul.f32 1.442695, %v617_v25  ;;  %v3267_v27 = vpop.xlane.xlu2 %778 }
 0x353   :  { %v3235_v55 = vpop.eup %2340  ;;  %v758_v7 = vmul.f32 1.442695, %v632_v40  ;;  %v760_v60 = vmul.f32 1.442695, %v633_v9  ;;  %v4308_v9 = vld [vmem:[#allocation16_spill] sm:$0xff] }
 0x354   :  { %v3239_v38 = vpop.eup %2342  ;;  %v612_v42 = vsub.f32 %v4308_v9, %v3092_v46 }
 0x355   :  { %2344 = vpow2.f32 %v758_v7  ;;  %v852_v62 = vadd.f32 %v3239_v38, %v3235_v55  ;;  %v613_v7 = vsub.f32 %v4309_v44, %v3092_v46  ;;  %v4313_v46 = vld [vmem:[#allocation14_spill] sm:$0xff] }
 0x356   :  { %2346 = vpow2.f32 %v760_v60  ;;  %v718_v40 = vmul.f32 1.442695, %v612_v42 }
 0x357   :  { %853 = vadd.xlane.f32.xlu2 %v852_v62  ;;  %2348 = vpow2.f32 %v726_v33  ;;  %v720_v60 = vmul.f32 1.442695, %v613_v7  ;;  %v4312_v33 = vld [vmem:[#allocation13_spill] sm:$0xff] }
 0x358   :  { %v3245_v5 = vpop.xlane.xlu1 %772  ;;  %2350 = vpow2.f32 %v728_v3  ;;  %v608_v9 = vsub.f32 %v4312_v33, %v3078_v56  ;;  %v609_v3 = vsub.f32 %v4313_v46, %v3078_v56  ;;  %v605_v56 = vsub.f32 %v4315_v12, %v3064_v43 }
 0x359   :  { %2352 = vpow2.f32 %v718_v40  ;;  %v4314_v40 = vld [vmem:[#allocation9_spill] sm:$0xff] }
 0x35a   :  { %2354 = vpow2.f32 %v720_v60  ;;  %v710_v44 = vmul.f32 1.442695, %v608_v9  ;;  %v712_v7 = vmul.f32 1.442695, %v609_v3  ;;  %v604_v33 = vsub.f32 %v4314_v40, %v3064_v43  ;;  %v806_v60 = vpop.xlane.xlu2 %805 }
 0x35b   :  { %v3249_v39 = vpop.eup %2344  ;;  %v704_v3 = vmul.f32 1.442695, %v605_v56 }
 0x35c   :  { %v3253_v23 = vpop.eup %2346  ;;  %2356 = vpow2.f32 %v710_v44  ;;  %v702_v46 = vmul.f32 1.442695, %v604_v33 }
 0x35d   :  { %v855_v63 = vadd.f32 %v3253_v23, %v3249_v39  ;;  %v3261_v25 = vpop.eup %2348  ;;  %2358 = vpow2.f32 %v712_v7 }
 0x35e   :  { %4310 = vst [vmem:[#allocation18_spill] sm:$0xff] %v3261_v25  ;;  %v3263_v62 = vpop.eup %2350  ;;  %2360 = vrcp.f32 %v806_v60 }
 0x35f   :  { %856 = vadd.xlane.f32.xlu2 %v855_v63  ;;  %4311 = vst [vmem:[#allocation19_spill] sm:$0xff] %v3263_v62  ;;  %v831_v42 = vadd.f32 %v3263_v62, %v3261_v25  ;;  %v3275_v34 = vpop.eup %2352 }
 0x360   :  { %v3259_v1 = vpop.xlane.xlu1 %769  ;;  %v3277_v11 = vpop.eup %2354 }
 0x361   :  { %v825_v9 = vadd.f32 %v3277_v11, %v3275_v34 }
 0x362   :  { %v3285_v25 = vpop.eup %2356 }
 0x363   :  { %v3287_v6 = vpop.eup %2358 }
 0x364   :  { %v819_v43 = vadd.f32 %v3287_v6, %v3285_v25  ;;  %v2361_v12 = vpop.eup %2360 }
 0x365   :  { %v919_v60 = vmul.f32 %v2361_v12, %v3018_v8 }
 0x367   :  { %832 = vadd.xlane.f32.xlu2 %v831_v42  ;;  %v803_v42 = vpop.xlane.xlu0 %802 }
 0x368   :  { %v3273_v63 = vpop.xlane.xlu1 %766 }
 0x36f   :  { %826 = vadd.xlane.f32.xlu2 %v825_v9 }
 0x370   :  { %v809_v62 = vpop.xlane.xlu1 %808 }
 0x371   :  { %2362 = vrcp.f32 %v809_v62 }
 0x372   :  { %2364 = vpow2.f32 %v702_v46 }
 0x373   :  { %2366 = vrcp.f32 %v803_v42 }
 0x374   :  { %2368 = vpow2.f32 %v704_v3 }
 0x375   :  { %2370 = vrcp.f32 %v3193_v58  ;;  %v918_v58 = vmul.f32 %v2361_v12, %v3014_v53  ;;  %v4318_v12 = vld [vmem:[#allocation22_spill] sm:$0xff] }
 0x376   :  { %2372 = vrcp.f32 %v3227_v15 }
 0x377   :  { %v2363_v44 = vpop.eup %2362  ;;  %820 = vadd.xlane.f32.xlu2 %v819_v43  ;;  %2374 = vrcp.f32 %v3211_v52 }
 0x378   :  { %v3293_v7 = vpop.eup %2364  ;;  %v920_v40 = vmul.f32 %v2363_v44, %v3112_v32  ;;  %v921_v62 = vmul.f32 %v2363_v44, %v3114_v50  ;;  %2376 = vrcp.f32 %v3231_v13 }
 0x379   :  { %v2367_v33 = vpop.eup %2366  ;;  %2378 = vrcp.f32 %v3219_v57 }
 0x37a   :  { %v3298_v56 = vpop.eup %2368  ;;  %954 = vmatpush.msrb.mxu2 %v920_v40  ;;  %994 = vmatpush.msrb.mxu0 %v921_v62  ;;  %v916_v32 = vmul.f32 %v2367_v33, %v2982_v29  ;;  %v917_v50 = vmul.f32 %v2367_v33, %v2987_v4  ;;  %2380 = vrcp.f32 %v3247_v28  ;;  %v4320_v33 = vld [vmem:[#allocation24_spill] sm:$0xff] }
 0x37b   :  { %v2371_v9 = vpop.eup %2370  ;;  %v813_v52 = vadd.f32 %v3298_v56, %v3293_v7  ;;  %2382 = vrcp.f32 %v3223_v2 }
 0x37c   :  { %955 = vmatpush.msrb.mxu2 %v918_v58  ;;  %995 = vmatpush.msrb.mxu0 %v919_v60  ;;  %v2373_v15 = vpop.eup %2372  ;;  %v914_v53 = vmul.f32 %v2371_v9, %v2994_v17  ;;  %v915_v8 = vmul.f32 %v2371_v9, %v2996_v18  ;;  %2384 = vrcp.f32 %v3267_v27 }
 0x37d   :  { %v2375_v46 = vpop.eup %2374  ;;  %v912_v29 = vmul.f32 %v2373_v15, %v2940_v45  ;;  %v913_v4 = vmul.f32 %v2373_v15, %v2945_v54  ;;  %2386 = vrcp.f32 %v3225_v10  ;;  %v58_v15 = vpop.f32.mrf.mxu0 }
 0x37e   :  { %956 = vmatpush.msrb.mxu2 %v916_v32  ;;  %996 = vmatpush.msrb.mxu0 %v917_v50  ;;  %v2377_v13 = vpop.eup %2376  ;;  %v910_v57 = vmul.f32 %v2375_v46, %v3010_v41  ;;  %v911_v17 = vmul.f32 %v2375_v46, %v3012_v59  ;;  %2388 = vrcp.f32 %v3245_v5  ;;  %v4321_v32 = vld [vmem:[#allocation25_spill] sm:$0xff] }
 0x37f   :  { %814 = vadd.xlane.f32.xlu2 %v813_v52  ;;  %v2379_v18 = vpop.eup %2378  ;;  %v908_v28 = vmul.f32 %v2377_v13, %v2950_v16  ;;  %v909_v45 = vmul.f32 %v2377_v13, %v2955_v61  ;;  %2390 = vrcp.f32 %v3259_v1  ;;  %v764_v61 = vpop.xlane.xlu1 %763  ;;  %v4317_v1 = vld [vmem:[#allocation21_spill] sm:$0xff] }
 0x380   :  { %957 = vmatpush.msrb.mxu2 %v914_v53  ;;  %997 = vmatpush.msrb.mxu0 %v915_v8  ;;  %v2381_v3 = vpop.eup %2380  ;;  %v906_v54 = vmul.f32 %v2379_v18, %v3026_v47  ;;  %v907_v41 = vmul.f32 %v2379_v18, %v3028_v51  ;;  %2392 = vrcp.f32 %v3273_v63  ;;  %v4319_v63 = vld [vmem:[#allocation23_spill] sm:$0xff]  ;;  %v1048_v53 = vld.sshfl [vmem:[#allocation1] sm:$0xff pattern:$0x75316420] }
 0x381   :  { %v2383_v2 = vpop.eup %2382  ;;  %v904_v59 = vmul.f32 %v2381_v3, %v2970_v26  ;;  %v905_v16 = vmul.f32 %v2381_v3, %v2974_v48  ;;  %v4316_v26 = vld [vmem:[#allocation20_spill] sm:$0xff]  ;;  %2394 = vrcp.f32 %v764_v61 }
 0x382   :  { %958 = vmatpush.msrb.mxu2 %v912_v29  ;;  %998 = vmatpush.msrb.mxu0 %v913_v4  ;;  %v2385_v27 = vpop.eup %2384  ;;  %v902_v10 = vmul.f32 %v2383_v2, %v3036_v30  ;;  %v903_v47 = vmul.f32 %v2383_v2, %v3038_v22 }
 0x383   :  { %v2387_v51 = vpop.eup %2386  ;;  %v900_v5 = vmul.f32 %v2385_v27, %v2998_v14  ;;  %v901_v42 = vmul.f32 %v2385_v27, %v4316_v26 }
 0x384   :  { %959 = vmatpush.msrb.mxu2 %v910_v57  ;;  %999 = vmatpush.msrb.mxu0 %v911_v17  ;;  %v2389_v48 = vpop.eup %2388  ;;  %v898_v43 = vmul.f32 %v2387_v51, %v4317_v1  ;;  %v899_v44 = vmul.f32 %v2387_v51, %v4318_v12 }
 0x385   :  { %v2391_v30 = vpop.eup %2390  ;;  %v896_v22 = vmul.f32 %v2389_v48, %v3074_v20  ;;  %v897_v40 = vmul.f32 %v2389_v48, %v4319_v63  ;;  %v4324_v48 = vld [vmem:[#allocation31_spill] sm:$0xff] }
 0x386   :  { %960 = vmatpush.msrb.mxu2 %v908_v28  ;;  %1000 = vmatpush.msrb.mxu0 %v909_v45  ;;  %v2393_v62 = vpop.eup %2392  ;;  %v894_v14 = vmul.f32 %v2391_v30, %v3088_v19  ;;  %v895_v58 = vmul.f32 %v2391_v30, %v4320_v33  ;;  %v3345_v19 = vld [vmem:[%s4187_s1] sm:$0xff] }
 0x387   :  { %v2395_v60 = vpop.eup %2394  ;;  %v892_v9 = vmul.f32 %v2393_v62, %v3100_v21  ;;  %v893_v50 = vmul.f32 %v2393_v62, %v4321_v32  ;;  %v839_v21 = vpop.xlane.xlu2 %838 }
 0x388   :  { %961 = vmatpush.msrb.mxu2 %v906_v54  ;;  %1001 = vmatpush.msrb.mxu0 %v907_v41  ;;  %v890_v20 = vmul.f32 %v2395_v60, %v3127_v0  ;;  %v891_v52 = vmul.f32 %v2395_v60, %v3129_v49  ;;  %v3352_v0 = vld [vmem:[%s4187_s1 + $0x8] sm:$0xff]  ;;  %v836_v46 = vpop.xlane.xlu1 %835 }
 0x38a   :  { %962 = vmatpush.msrb.mxu2 %v904_v59  ;;  %1002 = vmatpush.msrb.mxu0 %v905_v16 }
 0x38c   :  { %963 = vmatpush.msrb.mxu2 %v902_v10  ;;  %1003 = vmatpush.msrb.mxu0 %v903_v47 }
 0x38e   :  { %964 = vmatpush.msrb.mxu2 %v900_v5  ;;  %1004 = vmatpush.msrb.mxu0 %v901_v42  ;;  %v4322_v5 = vld [vmem:[#allocation15_spill] sm:$0xff] }
 0x38f   :  { %v845_v49 = vpop.xlane.xlu2 %844 }
 0x390   :  { %965 = vmatpush.msrb.mxu2 %v898_v43  ;;  %1005 = vmatpush.msrb.mxu0 %v899_v44  ;;  %v842_v4 = vpop.xlane.xlu1 %841  ;;  %v4326_v44 = vld [vmem:[#allocation27_spill] sm:$0xff] }
 0x392   :  { %966 = vmatpush.msrb.mxu2 %v896_v22  ;;  %1006 = vmatpush.msrb.mxu0 %v897_v40  ;;  %v4327_v22 = vld [vmem:[#allocation28_spill] sm:$0xff]  ;;  %v4328_v40 = vld [vmem:[#allocation29_spill] sm:$0xff] }
 0x394   :  { %967 = vmatpush.msrb.mxu2 %v894_v14  ;;  %1007 = vmatpush.msrb.mxu0 %v895_v58  ;;  %v4329_v58 = vld [vmem:[#allocation18_spill] sm:$0xff] }
 0x396   :  { %968 = vmatpush.msrb.mxu2 %v892_v9  ;;  %1008 = vmatpush.msrb.mxu0 %v893_v50  ;;  %v4330_v9 = vld [vmem:[#allocation19_spill] sm:$0xff] }
 0x397   :  { %v848_v8 = vpop.xlane.xlu2 %847 }
 0x398   :  { %969 = vmatpush.msrb.mxu2 %v890_v20  ;;  %1009 = vmatpush.msrb.mxu0 %v891_v52  ;;  %v830_v57 = vpop.xlane.xlu1 %829  ;;  %v4332_v52 = vld [vmem:[#allocation33_spill] sm:$0xff] }
 0x399   :  { %970 = vmatmul.f32.vlgmr.msrb.gmra.mxu2 %v58_v15  ;;  %1010 = vmatmul.f32.vlgmr.msrb.gmra.mxu0 %v58_v15  ;;  %v4331_v15 = vld [vmem:[#allocation32_spill] sm:$0xff] }
 0x39a   :  { %2160 = vmatpush.msk.msra.mxu0 %vm30_vm0, %v1048_v53 }
 0x39f   :  { %v851_v29 = vpop.xlane.xlu2 %850 }
 0x3a0   :  { %v824_v2 = vpop.xlane.xlu1 %823 }
 0x3a1   :  { %2161 = vmatmul.msk.f32.vlgmr.msra.gmra.mxu0 %vm20_vm1, %v3345_v19 }
 0x3a8   :  { %v818_v43 = vpop.xlane.xlu1 %817 }
 0x3a9   :  { %2162 = vmatmul.msk.f32.gmra.mxu0 %vm20_vm1, %v3352_v0 }
 0x3ca   :  { %v854_v13 = vpop.xlane.xlu2 %853 }
 0x3cb   :  { %2396 = vrcp.f32 %v854_v13 }
 0x3d1   :  { %v2397_v18 = vpop.eup %2396 }
 0x3d2   :  { %v857_v17 = vpop.xlane.xlu2 %856  ;;  %v950_v59 = vmul.f32 %v2397_v18, %v3235_v55  ;;  %v951_v16 = vmul.f32 %v2397_v18, %v3239_v38 }
 0x3d3   :  { %2398 = vrcp.f32 %v857_v17 }
 0x3d4   :  { %2400 = vrcp.f32 %v851_v29 }
 0x3d5   :  { %2402 = vrcp.f32 %v848_v8 }
 0x3d6   :  { %2404 = vrcp.f32 %v845_v49 }
 0x3d7   :  { %2406 = vrcp.f32 %v842_v4  ;;  %v4333_v4 = vld [vmem:[#allocation11_spill] sm:$0xff] }
 0x3d8   :  { %2408 = vrcp.f32 %v839_v21 }
 0x3d9   :  { %v2399_v28 = vpop.eup %2398  ;;  %2410 = vrcp.f32 %v836_v46  ;;  %v812_v46 = vpop.xlane.xlu1 %811 }
 0x3da   :  { %v833_v45 = vpop.xlane.xlu2 %832  ;;  %v952_v3 = vmul.f32 %v2399_v28, %v3249_v39  ;;  %v953_v54 = vmul.f32 %v2399_v28, %v3253_v23  ;;  %v2401_v41 = vpop.eup %2400 }
 0x3db   :  { %v2403_v27 = vpop.eup %2402  ;;  %v948_v61 = vmul.f32 %v2401_v41, %v3199_v31  ;;  %v949_v10 = vmul.f32 %v2401_v41, %v3203_v37  ;;  %2412 = vrcp.f32 %v833_v45  ;;  %v4323_v37 = vld [vmem:[#allocation30_spill] sm:$0xff] }
 0x3dc   :  { %974 = vmatpush.msrb.mxu3 %v952_v3  ;;  %1014 = vmatpush.msrb.mxu1 %v953_v54  ;;  %v2405_v39 = vpop.eup %2404  ;;  %v946_v23 = vmul.f32 %v2403_v27, %v3181_v35  ;;  %v947_v47 = vmul.f32 %v2403_v27, %v3185_v24  ;;  %2414 = vrcp.f32 %v830_v57  ;;  %v4325_v24 = vld [vmem:[#allocation26_spill] sm:$0xff]  ;;  %v4334_v57 = vld [vmem:[#allocation12_spill] sm:$0xff] }
 0x3dd   :  { %v2407_v51 = vpop.eup %2406  ;;  %v944_v55 = vmul.f32 %v2405_v39, %v3163_v36  ;;  %v945_v26 = vmul.f32 %v2405_v39, %v4322_v5  ;;  %v4336_v54 = vld [vmem:[#allocation8_spill] sm:$0xff] }
 0x3de   :  { %975 = vmatpush.msrb.mxu3 %v950_v59  ;;  %1015 = vmatpush.msrb.mxu1 %v951_v16  ;;  %v2409_v31 = vpop.eup %2408  ;;  %v942_v42 = vmul.f32 %v2407_v51, %v4323_v37  ;;  %v943_v1 = vmul.f32 %v2407_v51, %v4324_v48  ;;  %v1045_v51 = vld [vmem:[%s4187_s1 + $0x10] sm:$0xf]  ;;  %s2646_s1 = smov [#allocation2]  }
 0x3df   :  { %v2411_v35 = vpop.eup %2410  ;;  %v940_v12 = vmul.f32 %v2409_v31, %v4325_v24  ;;  %v941_v30 = vmul.f32 %v2409_v31, %v4326_v44  ;;  %2163 = vmatmul.msk.f32.gmra.mxu0 %vm20_vm1, %v1045_v51  ;;  %s2073_s24 = sshll.u32 %s2646_s1, 4  ;;  %s2074_s24 = int_to_ptr.vmem [resolvable:$true] %s2073_s24 }
 0x3e0   :  { %976 = vmatpush.msrb.mxu3 %v948_v61  ;;  %1016 = vmatpush.msrb.mxu1 %v949_v10  ;;  %v938_v63 = vmul.f32 %v2411_v35, %v4327_v22  ;;  %v939_v62 = vmul.f32 %v2411_v35, %v4328_v40  ;;  %v4337_v61 = vld [vmem:[#allocation34_spill] sm:$0xff]  ;;  %v4338_v10 = vld [vmem:[#allocation35_spill] sm:$0xff] }
 0x3e1   :  { %v2413_v36 = vpop.eup %2412 }
 0x3e2   :  { %977 = vmatpush.msrb.mxu3 %v946_v23  ;;  %1017 = vmatpush.msrb.mxu1 %v947_v47  ;;  %v827_v38 = vpop.xlane.xlu2 %826  ;;  %v2415_v14 = vpop.eup %2414  ;;  %v936_v60 = vmul.f32 %v2413_v36, %v4329_v58  ;;  %v937_v32 = vmul.f32 %v2413_v36, %v4330_v9  ;;  %v1049_v23 = vld.sshfl [vmem:[#allocation1 + $0x8] sm:$0xff pattern:$0x75316420] }
 0x3e3   :  { %2416 = vrcp.f32 %v827_v38  ;;  %v934_v20 = vmul.f32 %v2415_v14, %v4331_v15  ;;  %v935_v53 = vmul.f32 %v2415_v14, %v4332_v52 }
 0x3e4   :  { %978 = vmatpush.msrb.mxu3 %v944_v55  ;;  %1018 = vmatpush.msrb.mxu1 %v945_v26  ;;  %2418 = vrcp.f32 %v824_v2 }
 0x3e5   :  { %2420 = vrcp.f32 %v818_v43 }
 0x3e6   :  { %979 = vmatpush.msrb.mxu3 %v942_v42  ;;  %1019 = vmatpush.msrb.mxu1 %v943_v1  ;;  %v4339_v42 = vld [vmem:[#allocation5_spill] sm:$0xff] }
 0x3e8   :  { %980 = vmatpush.msrb.mxu3 %v940_v12  ;;  %1020 = vmatpush.msrb.mxu1 %v941_v30 }
 0x3e9   :  { %v2417_v50 = vpop.eup %2416 }
 0x3ea   :  { %v821_v33 = vpop.xlane.xlu2 %820  ;;  %981 = vmatpush.msrb.mxu3 %v938_v63  ;;  %1021 = vmatpush.msrb.mxu1 %v939_v62  ;;  %v2419_v21 = vpop.eup %2418  ;;  %v932_v49 = vmul.f32 %v2417_v50, %v3275_v34  ;;  %v933_v8 = vmul.f32 %v2417_v50, %v3277_v11  ;;  %v4335_v34 = vld [vmem:[#allocation7_spill] sm:$0xff] }
 0x3eb   :  { %2422 = vrcp.f32 %v821_v33  ;;  %v2421_v29 = vpop.eup %2420  ;;  %v930_v13 = vmul.f32 %v2419_v21, %v4333_v4  ;;  %v931_v17 = vmul.f32 %v2419_v21, %v4334_v57 }
 0x3ec   :  { %982 = vmatpush.msrb.mxu3 %v936_v60  ;;  %1022 = vmatpush.msrb.mxu1 %v937_v32  ;;  %2424 = vrcp.f32 %v812_v46  ;;  %v926_v11 = vmul.f32 %v2421_v29, %v4335_v34  ;;  %v927_v41 = vmul.f32 %v2421_v29, %v4336_v54 }
 0x3ee   :  { %983 = vmatpush.msrb.mxu3 %v934_v20  ;;  %1023 = vmatpush.msrb.mxu1 %v935_v53 }
 0x3f0   :  { %984 = vmatpush.msrb.mxu3 %v932_v49  ;;  %1024 = vmatpush.msrb.mxu1 %v933_v8 }
 0x3f1   :  { %v2423_v18 = vpop.eup %2422 }
 0x3f2   :  { %v815_v28 = vpop.xlane.xlu2 %814  ;;  %985 = vmatpush.msrb.mxu3 %v930_v13  ;;  %1025 = vmatpush.msrb.mxu1 %v931_v17  ;;  %v928_v45 = vmul.f32 %v2423_v18, %v3285_v25  ;;  %v929_v3 = vmul.f32 %v2423_v18, %v3287_v6  ;;  %v2425_v2 = vpop.eup %2424 }
 0x3f3   :  { %2426 = vrcp.f32 %v815_v28  ;;  %v84_v25 = vpop.f32.mrf.mxu1  ;;  %v922_v6 = vmul.f32 %v2425_v2, %v4337_v61  ;;  %v923_v39 = vmul.f32 %v2425_v2, %v4338_v10 }
 0x3f4   :  { %986 = vmatpush.msrb.mxu3 %v928_v45  ;;  %1026 = vmatpush.msrb.mxu1 %v929_v3 }
 0x3f6   :  { %987 = vmatpush.msrb.mxu3 %v926_v11  ;;  %1027 = vmatpush.msrb.mxu1 %v927_v41 }
 0x3f9   :  { %v2427_v59 = vpop.eup %2426 }
 0x3fa   :  { %v924_v16 = vmul.f32 %v2427_v59, %v3293_v7  ;;  %v925_v27 = vmul.f32 %v2427_v59, %v3298_v56 }
 0x3fc   :  { %988 = vmatpush.msrb.mxu3 %v924_v16  ;;  %1028 = vmatpush.msrb.mxu1 %v925_v27 }
 0x3fe   :  { %989 = vmatpush.msrb.mxu3 %v922_v6  ;;  %1029 = vmatpush.msrb.mxu1 %v923_v39 }
 0x3ff   :  { %990 = vmatmul.f32.vlgmr.msrb.gmra.mxu3 %v84_v25  ;;  %1030 = vmatmul.f32.vlgmr.msrb.gmra.mxu1 %v84_v25 }
 0x400   :  { %2164 = vmatpush.msk.msra.mxu1 %vm30_vm0, %v1049_v23 }
 0x407   :  { %2165 = vmatmul.msk.f32.vlgmr.msra.gmra.mxu1 %vm20_vm1, %v3345_v19 }
 0x40f   :  { %2166 = vmatmul.msk.f32.gmra.mxu1 %vm20_vm1, %v3352_v0 }
 0x416   :  { %v1011_v7 = vpop.f32.mrf.mxu0 }
 0x417   :  { %2167 = vmatmul.msk.f32.gmra.mxu1 %vm20_vm1, %v1045_v51 }
 0x41c   :  { %v971_v5 = vpop.f32.mrf.mxu2 }
 0x41e   :  { %v1080_v56 = vpop.f32.mrf.mxu0 }
 0x41f   :  { %1290 = vmatpush.msrb.mxu0 %v1080_v56 }
 0x426   :  { %v1083_v47 = vpop.f32.mrf.mxu0 }
 0x427   :  { %1115 = vxpose.xlu2.b32.start.end [1/1] (short) %v1083_v47, 128 }
 0x45c   :  { %v3430_v32 = vpop.f32.mrf.mxu0 }
 0x45d   :  { %4340 = vst [vmem:[#allocation16_spill] sm:$0xff] %v3430_v32 }
 0x47c   :  { %v1031_v38 = vpop.f32.mrf.mxu1 }
 0x47d   :  { %v1032_v55 = vadd.f32 %v1031_v38, %v1011_v7 }
 0x47f   :  { %v1036_v26 = vrot.slane %v1032_v55, 4 }
 0x482   :  { %v991_v19 = vpop.f32.mrf.mxu3 }
 0x483   :  { %v992_v31 = vadd.f32 %v991_v19, %v971_v5 }
 0x484   :  { %v1106_v0 = vpop.f32.mrf.mxu1 }
 0x485   :  { %v1037_v37 = vsel %vm30_vm0, %v992_v31, %v1036_v26  ;;  %1403 = vmatpush.msrb.mxu1 %v1106_v0 }
 0x486   :  { %v1039_v48 = vadd.f32 %v1037_v37, %v4339_v42 }
 0x488   :  { %1040 = vst [vmem:[#allocation2] sm:$0xff] %v1039_v48 }
 0x48c   :  { %v1109_v1 = vpop.f32.mrf.mxu1 }
 0x48d   :  { %1147 = vxpose.xlu1.b32.start.end [1/1] (short) %v1109_v1, 128 }
 0x494   :  { %v3432_v50 = vpop.f32.mrf.mxu1 }
 0x495   :  { %4341 = vst [vmem:[#allocation17_spill] sm:$0xff] %v3432_v50 }
 0x4c0   :  { %v1131_v35 = vpop.trf.xlu2 }
 0x4c1   :  { %2168 = vmatmul.msk.f32.vlgmr.msrb.gmra.mxu0 %vm151_vm2, %v1131_v35  ;;  %2200 = vmatmul.msk.f32.vlgmr.msrb.gmra.mxu1 %vm151_vm2, %v1131_v35 }
 0x4c8   :  { %v1132_v43 = vpop.trf.xlu2 }
 0x4c9   :  { %2169 = vmatmul.msk.f32.gmra.mxu0 %vm151_vm2, %v1132_v43  ;;  %2201 = vmatmul.msk.f32.gmra.mxu1 %vm151_vm2, %v1132_v43 }
 0x4d0   :  { %v1133_v24 = vpop.trf.xlu2 }
 0x4d1   :  { %2170 = vmatmul.msk.f32.gmra.mxu0 %vm151_vm2, %v1133_v24  ;;  %2202 = vmatmul.msk.f32.gmra.mxu1 %vm151_vm2, %v1133_v24 }
 0x4d8   :  { %v1134_v12 = vpop.trf.xlu2 }
 0x4d9   :  { %2171 = vmatmul.msk.f32.gmra.mxu0 %vm151_vm2, %v1134_v12  ;;  %2203 = vmatmul.msk.f32.gmra.mxu1 %vm151_vm2, %v1134_v12 }
 0x4e0   :  { %v1135_v44 = vpop.trf.xlu2 }
 0x4e1   :  { %2172 = vmatmul.msk.f32.gmra.mxu0 %vm151_vm2, %v1135_v44  ;;  %2204 = vmatmul.msk.f32.gmra.mxu1 %vm151_vm2, %v1135_v44 }
 0x4e8   :  { %v1136_v30 = vpop.trf.xlu2 }
 0x4e9   :  { %2173 = vmatmul.msk.f32.gmra.mxu0 %vm151_vm2, %v1136_v30  ;;  %2205 = vmatmul.msk.f32.gmra.mxu1 %vm151_vm2, %v1136_v30 }
 0x4f0   :  { %v1137_v36 = vpop.trf.xlu2 }
 0x4f1   :  { %2174 = vmatmul.msk.f32.gmra.mxu0 %vm151_vm2, %v1137_v36  ;;  %2206 = vmatmul.msk.f32.gmra.mxu1 %vm151_vm2, %v1137_v36 }
 0x4f8   :  { %v1138_v22 = vpop.trf.xlu2 }
 0x4f9   :  { %2175 = vmatmul.msk.f32.gmra.mxu0 %vm151_vm2, %v1138_v22  ;;  %2207 = vmatmul.msk.f32.gmra.mxu1 %vm151_vm2, %v1138_v22 }
 0x500   :  { %v1139_v63 = vpop.trf.xlu2 }
 0x501   :  { %2176 = vmatmul.msk.f32.gmra.mxu0 %vm151_vm2, %v1139_v63  ;;  %2208 = vmatmul.msk.f32.gmra.mxu1 %vm151_vm2, %v1139_v63 }
 0x508   :  { %v1140_v40 = vpop.trf.xlu2 }
 0x509   :  { %2177 = vmatmul.msk.f32.gmra.mxu0 %vm151_vm2, %v1140_v40  ;;  %2209 = vmatmul.msk.f32.gmra.mxu1 %vm151_vm2, %v1140_v40 }
 0x510   :  { %v1141_v62 = vpop.trf.xlu2 }
 0x511   :  { %2178 = vmatmul.msk.f32.gmra.mxu0 %vm151_vm2, %v1141_v62  ;;  %2210 = vmatmul.msk.f32.gmra.mxu1 %vm151_vm2, %v1141_v62 }
 0x518   :  { %v1142_v14 = vpop.trf.xlu2 }
 0x519   :  { %2179 = vmatmul.msk.f32.gmra.mxu0 %vm151_vm2, %v1142_v14  ;;  %2211 = vmatmul.msk.f32.gmra.mxu1 %vm151_vm2, %v1142_v14 }
 0x520   :  { %v1143_v33 = vpop.trf.xlu2 }
 0x521   :  { %2180 = vmatmul.msk.f32.gmra.mxu0 %vm151_vm2, %v1143_v33  ;;  %2212 = vmatmul.msk.f32.gmra.mxu1 %vm151_vm2, %v1143_v33 }
 0x528   :  { %v1144_v58 = vpop.trf.xlu2 }
 0x529   :  { %2181 = vmatmul.msk.f32.gmra.mxu0 %vm151_vm2, %v1144_v58  ;;  %2213 = vmatmul.msk.f32.gmra.mxu1 %vm151_vm2, %v1144_v58 }
 0x530   :  { %v1145_v60 = vpop.trf.xlu2 }
 0x531   :  { %2182 = vmatmul.msk.f32.gmra.mxu0 %vm151_vm2, %v1145_v60  ;;  %2214 = vmatmul.msk.f32.gmra.mxu1 %vm151_vm2, %v1145_v60  ;;  %v1163_v9 = vpop.trf.xlu1 }
 0x538   :  { %v1146_v15 = vpop.trf.xlu2 }
 0x539   :  { %2183 = vmatmul.msk.f32.gmra.mxu0 %vm151_vm2, %v1146_v15  ;;  %2215 = vmatmul.msk.f32.gmra.mxu1 %vm151_vm2, %v1146_v15  ;;  %v1164_v20 = vpop.trf.xlu1 }
 0x53e   :  { %v3436_v52 = vpop.f32.mrf.mxu0  ;;  %v3438_v53 = vpop.f32.mrf.mxu1 }
 0x53f   :  { %4342 = vst [vmem:[#allocation13_spill] sm:$0xff] %v3436_v52  ;;  %v1501_v41 = vmax.f32 %v3436_v52, %v3438_v53 }
 0x540   :  { %4343 = vst [vmem:[#allocation14_spill] sm:$0xff] %v3438_v53 }
 0x541   :  { %2184 = vmatmul.msk.f32.gmra.mxu0 %vm151_vm2, %v1163_v9  ;;  %2216 = vmatmul.msk.f32.gmra.mxu1 %vm151_vm2, %v1163_v9  ;;  %v1165_v21 = vpop.trf.xlu1 }
 0x546   :  { %v3442_v49 = vpop.f32.mrf.mxu0  ;;  %v3444_v8 = vpop.f32.mrf.mxu1 }
 0x547   :  { %4344 = vst [vmem:[#allocation9_spill] sm:$0xff] %v3442_v49  ;;  %v1504_v46 = vmax.f32 %v3442_v49, %v3444_v8 }
 0x548   :  { %4345 = vst [vmem:[#allocation10_spill] sm:$0xff] %v3444_v8 }
 0x549   :  { %2185 = vmatmul.msk.f32.gmra.mxu0 %vm151_vm2, %v1164_v20  ;;  %2217 = vmatmul.msk.f32.gmra.mxu1 %vm151_vm2, %v1164_v20  ;;  %v1166_v29 = vpop.trf.xlu1 }
 0x54a   :  { %1505 = vmax.xlane.f32.xlu2 %v1504_v46 }
 0x54e   :  { %v3450_v4 = vpop.f32.mrf.mxu0  ;;  %v3452_v13 = vpop.f32.mrf.mxu1 }
 0x54f   :  { %v1507_v57 = vmax.f32 %v3450_v4, %v3452_v13 }
 0x551   :  { %2186 = vmatmul.msk.f32.gmra.mxu0 %vm151_vm2, %v1165_v21  ;;  %2218 = vmatmul.msk.f32.gmra.mxu1 %vm151_vm2, %v1165_v21  ;;  %v1167_v17 = vpop.trf.xlu1 }
 0x552   :  { %1508 = vmax.xlane.f32.xlu0 %v1507_v57 }
 0x556   :  { %v3458_v18 = vpop.f32.mrf.mxu0  ;;  %v3460_v28 = vpop.f32.mrf.mxu1 }
 0x557   :  { %4346 = vst [vmem:[#allocation20_spill] sm:$0xff] %v3458_v18  ;;  %v1510_v25 = vmax.f32 %v3458_v18, %v3460_v28 }
 0x558   :  { %4347 = vst [vmem:[#allocation21_spill] sm:$0xff] %v3460_v28 }
 0x559   :  { %2187 = vmatmul.msk.f32.gmra.mxu0 %vm151_vm2, %v1166_v29  ;;  %2219 = vmatmul.msk.f32.gmra.mxu1 %vm151_vm2, %v1166_v29  ;;  %v1168_v45 = vpop.trf.xlu1 }
 0x55e   :  { %v3464_v3 = vpop.f32.mrf.mxu0  ;;  %v3466_v34 = vpop.f32.mrf.mxu1 }
 0x55f   :  { %4348 = vst [vmem:[#allocation22_spill] sm:$0xff] %v3464_v3  ;;  %v1513_v11 = vmax.f32 %v3464_v3, %v3466_v34 }
 0x560   :  { %4349 = vst [vmem:[#allocation23_spill] sm:$0xff] %v3466_v34 }
 0x561   :  { %2188 = vmatmul.msk.f32.gmra.mxu0 %vm151_vm2, %v1167_v17  ;;  %2220 = vmatmul.msk.f32.gmra.mxu1 %vm151_vm2, %v1167_v17  ;;  %v1169_v54 = vpop.trf.xlu1 }
 0x562   :  { %1514 = vmax.xlane.f32.xlu2 %v1513_v11 }
 0x565   :  { %1502 = vmax.xlane.f32.xlu1 %v1501_v41 }
 0x566   :  { %v3474_v2 = vpop.f32.mrf.mxu0  ;;  %v3476_v59 = vpop.f32.mrf.mxu1 }
 0x567   :  { %v1516_v16 = vmax.f32 %v3474_v2, %v3476_v59 }
 0x569   :  { %2189 = vmatmul.msk.f32.gmra.mxu0 %vm151_vm2, %v1168_v45  ;;  %2221 = vmatmul.msk.f32.gmra.mxu1 %vm151_vm2, %v1168_v45  ;;  %v1170_v27 = vpop.trf.xlu1 }
 0x56a   :  { %1517 = vmax.xlane.f32.xlu0 %v1516_v16 }
 0x56d   :  { %1511 = vmax.xlane.f32.xlu1 %v1510_v25 }
 0x56e   :  { %v3484_v61 = vpop.f32.mrf.mxu0  ;;  %v3486_v6 = vpop.f32.mrf.mxu1 }
 0x56f   :  { %v1519_v10 = vmax.f32 %v3484_v61, %v3486_v6 }
 0x571   :  { %2190 = vmatmul.msk.f32.gmra.mxu0 %vm151_vm2, %v1169_v54  ;;  %2222 = vmatmul.msk.f32.gmra.mxu1 %vm151_vm2, %v1169_v54  ;;  %v1171_v39 = vpop.trf.xlu1 }
 0x572   :  { %1520 = vmax.xlane.f32.xlu0 %v1519_v10 }
 0x576   :  { %v3492_v23 = vpop.f32.mrf.mxu0  ;;  %v3494_v7 = vpop.f32.mrf.mxu1 }
 0x577   :  { %v1522_v56 = vmax.f32 %v3492_v23, %v3494_v7 }
 0x579   :  { %2191 = vmatmul.msk.f32.gmra.mxu0 %vm151_vm2, %v1170_v27  ;;  %2223 = vmatmul.msk.f32.gmra.mxu1 %vm151_vm2, %v1170_v27  ;;  %v1172_v47 = vpop.trf.xlu1 }
 0x57a   :  { %1523 = vmax.xlane.f32.xlu0 %v1522_v56 }
 0x57e   :  { %v3500_v51 = vpop.f32.mrf.mxu0  ;;  %v3502_v38 = vpop.f32.mrf.mxu1 }
 0x57f   :  { %v1525_v55 = vmax.f32 %v3500_v51, %v3502_v38 }
 0x581   :  { %2192 = vmatmul.msk.f32.gmra.mxu0 %vm151_vm2, %v1171_v39  ;;  %2224 = vmatmul.msk.f32.gmra.mxu1 %vm151_vm2, %v1171_v39  ;;  %v1173_v5 = vpop.trf.xlu1 }
 0x582   :  { %1526 = vmax.xlane.f32.xlu0 %v1525_v55 }
 0x586   :  { %v3508_v19 = vpop.f32.mrf.mxu0  ;;  %v3510_v26 = vpop.f32.mrf.mxu1 }
 0x587   :  { %v1528_v31 = vmax.f32 %v3508_v19, %v3510_v26 }
 0x589   :  { %2193 = vmatmul.msk.f32.gmra.mxu0 %vm151_vm2, %v1172_v47  ;;  %2225 = vmatmul.msk.f32.gmra.mxu1 %vm151_vm2, %v1172_v47  ;;  %v1174_v0 = vpop.trf.xlu1 }
 0x58a   :  { %1529 = vmax.xlane.f32.xlu0 %v1528_v31 }
 0x58e   :  { %v3516_v37 = vpop.f32.mrf.mxu0  ;;  %v3518_v42 = vpop.f32.mrf.mxu1 }
 0x58f   :  { %v1531_v48 = vmax.f32 %v3516_v37, %v3518_v42 }
 0x591   :  { %2194 = vmatmul.msk.f32.gmra.mxu0 %vm151_vm2, %v1173_v5  ;;  %2226 = vmatmul.msk.f32.gmra.mxu1 %vm151_vm2, %v1173_v5  ;;  %v1175_v24 = vpop.trf.xlu1 }
 0x592   :  { %1532 = vmax.xlane.f32.xlu0 %v1531_v48 }
 0x596   :  { %v3524_v1 = vpop.f32.mrf.mxu0  ;;  %v3526_v35 = vpop.f32.mrf.mxu1 }
 0x597   :  { %v1534_v43 = vmax.f32 %v3524_v1, %v3526_v35 }
 0x599   :  { %2195 = vmatmul.msk.f32.gmra.mxu0 %vm151_vm2, %v1174_v0  ;;  %2227 = vmatmul.msk.f32.gmra.mxu1 %vm151_vm2, %v1174_v0  ;;  %v1176_v36 = vpop.trf.xlu1 }
 0x59a   :  { %1535 = vmax.xlane.f32.xlu0 %v1534_v43 }
 0x59e   :  { %v3532_v12 = vpop.f32.mrf.mxu0  ;;  %v3534_v44 = vpop.f32.mrf.mxu1 }
 0x59f   :  { %v1537_v30 = vmax.f32 %v3532_v12, %v3534_v44 }
 0x5a1   :  { %2196 = vmatmul.msk.f32.gmra.mxu0 %vm151_vm2, %v1175_v24  ;;  %2228 = vmatmul.msk.f32.gmra.mxu1 %vm151_vm2, %v1175_v24  ;;  %v1177_v62 = vpop.trf.xlu1 }
 0x5a2   :  { %1538 = vmax.xlane.f32.xlu0 %v1537_v30 }
 0x5a6   :  { %v3540_v22 = vpop.f32.mrf.mxu0  ;;  %v3542_v63 = vpop.f32.mrf.mxu1 }
 0x5a7   :  { %v1540_v40 = vmax.f32 %v3540_v22, %v3542_v63 }
 0x5a9   :  { %2197 = vmatmul.msk.f32.gmra.mxu0 %vm151_vm2, %v1176_v36  ;;  %2229 = vmatmul.msk.f32.gmra.mxu1 %vm151_vm2, %v1176_v36  ;;  %v1178_v60 = vpop.trf.xlu1 }
 0x5aa   :  { %1541 = vmax.xlane.f32.xlu0 %v1540_v40 }
 0x5ae   :  { %v3548_v14 = vpop.f32.mrf.mxu0  ;;  %v3550_v33 = vpop.f32.mrf.mxu1 }
 0x5af   :  { %v1543_v58 = vmax.f32 %v3548_v14, %v3550_v33 }
 0x5b1   :  { %2198 = vmatmul.msk.f32.gmra.mxu0 %vm151_vm2, %v1177_v62  ;;  %2230 = vmatmul.msk.f32.gmra.mxu1 %vm151_vm2, %v1177_v62 }
 0x5b2   :  { %1544 = vmax.xlane.f32.xlu0 %v1543_v58 }
 0x5b6   :  { %v3556_v9 = vpop.f32.mrf.mxu0  ;;  %v3558_v15 = vpop.f32.mrf.mxu1 }
 0x5b7   :  { %v1546_v20 = vmax.f32 %v3556_v9, %v3558_v15 }
 0x5b9   :  { %2199 = vmatmul.msk.f32.gmra.mxu0 %vm151_vm2, %v1178_v60  ;;  %2231 = vmatmul.msk.f32.gmra.mxu1 %vm151_vm2, %v1178_v60 }
 0x5ba   :  { %1547 = vmax.xlane.f32.xlu2 %v1546_v20 }
 0x5be   :  { %v3564_v21 = vpop.f32.mrf.mxu0  ;;  %v3566_v46 = vpop.f32.mrf.mxu1 }
 0x5bf   :  { %4350 = vst [vmem:[#allocation24_spill] sm:$0xff] %v3564_v21  ;;  %v1549_v29 = vmax.f32 %v3564_v21, %v3566_v46 }
 0x5c0   :  { %4351 = vst [vmem:[#allocation25_spill] sm:$0xff] %v3566_v46 }
 0x5c2   :  { %1550 = vmax.xlane.f32.xlu2 %v1549_v29 }
 0x5c5   :  { %v3582_v16 = vpop.xlane.xlu0 %1508 }
 0x5c6   :  { %v3570_v57 = vpop.f32.mrf.mxu0  ;;  %v3572_v17 = vpop.f32.mrf.mxu1 }
 0x5c7   :  { %4352 = vst [vmem:[#allocation15_spill] sm:$0xff] %v3570_v57  ;;  %v1552_v45 = vmax.f32 %v3570_v57, %v3572_v17 }
 0x5c8   :  { %4353 = vst [vmem:[#allocation30_spill] sm:$0xff] %v3572_v17 }
 0x5c9   :  { %1553 = vmax.xlane.f32.xlu0 %v1552_v45 }
 0x5ce   :  { %v3576_v11 = vpop.f32.mrf.mxu0  ;;  %v3578_v54 = vpop.f32.mrf.mxu1 }
 0x5cf   :  { %4354 = vst [vmem:[#allocation31_spill] sm:$0xff] %v3576_v11  ;;  %v1555_v41 = vmax.f32 %v3576_v11, %v3578_v54 }
 0x5d0   :  { %4355 = vst [vmem:[#allocation26_spill] sm:$0xff] %v3578_v54 }
 0x5d1   :  { %1556 = vmax.xlane.f32.xlu1 %v1555_v41 }
 0x5d6   :  { %v3584_v27 = vpop.f32.mrf.mxu0  ;;  %v3586_v25 = vpop.f32.mrf.mxu1 }
 0x5d7   :  { %4356 = vst [vmem:[#allocation27_spill] sm:$0xff] %v3584_v27  ;;  %v1558_v10 = vmax.f32 %v3584_v27, %v3586_v25 }
 0x5d8   :  { %4357 = vst [vmem:[#allocation28_spill] sm:$0xff] %v3586_v25 }
 0x5d9   :  { %1559 = vmax.xlane.f32.xlu2 %v1558_v10 }
 0x5dd   :  { %v3590_v39 = vpop.xlane.xlu0 %1517 }
 0x5de   :  { %v3592_v56 = vpop.f32.mrf.mxu0  ;;  %v3594_v47 = vpop.f32.mrf.mxu1 }
 0x5df   :  { %v1561_v55 = vmax.f32 %v3592_v56, %v3594_v47 }
 0x5e1   :  { %1562 = vmax.xlane.f32.xlu0 %v1561_v55 }
 0x5e5   :  { %v3598_v5 = vpop.xlane.xlu0 %1520 }
 0x5e6   :  { %v3600_v31 = vpop.f32.mrf.mxu0  ;;  %v3602_v0 = vpop.f32.mrf.mxu1 }
 0x5e7   :  { %4358 = vst [vmem:[#allocation29_spill] sm:$0xff] %v3602_v0  ;;  %v1564_v48 = vmax.f32 %v3600_v31, %v3602_v0 }
 0x5e9   :  { %1565 = vmax.xlane.f32.xlu0 %v1564_v48 }
 0x5ed   :  { %v3606_v43 = vpop.xlane.xlu0 %1523 }
 0x5ee   :  { %v3608_v24 = vpop.f32.mrf.mxu0  ;;  %v3610_v30 = vpop.f32.mrf.mxu1 }
 0x5ef   :  { %v1567_v36 = vmax.f32 %v3608_v24, %v3610_v30 }
 0x5f1   :  { %1568 = vmax.xlane.f32.xlu0 %v1567_v36 }
 0x5f5   :  { %v3614_v40 = vpop.xlane.xlu0 %1526 }
 0x5f6   :  { %v3616_v62 = vpop.f32.mrf.mxu0  ;;  %v3618_v58 = vpop.f32.mrf.mxu1 }
 0x5f7   :  { %v1570_v60 = vmax.f32 %v3616_v62, %v3618_v58 }
 0x5f9   :  { %1571 = vmax.xlane.f32.xlu0 %v1570_v60 }
 0x5fd   :  { %v1530_v20 = vpop.xlane.xlu0 %1529 }
 0x5fe   :  { %v3622_v29 = vpop.f32.mrf.mxu0  ;;  %v3624_v45 = vpop.f32.mrf.mxu1 }
 0x5ff   :  { %v1573_v41 = vmax.f32 %v3622_v29, %v3624_v45 }
 0x601   :  { %1574 = vmax.xlane.f32.xlu0 %v1573_v41 }
 0x605   :  { %v3628_v10 = vpop.xlane.xlu0 %1532 }
 0x606   :  { %v3630_v55 = vpop.f32.mrf.mxu0  ;;  %v3632_v48 = vpop.f32.mrf.mxu1 }
 0x607   :  { %v1576_v36 = vmax.f32 %v3630_v55, %v3632_v48 }
 0x609   :  { %1577 = vmax.xlane.f32.xlu0 %v1576_v36 }
 0x60d   :  { %v1536_v60 = vpop.xlane.xlu0 %1535 }
 0x60e   :  { %v3636_v50 = vpop.f32.mrf.mxu0  ;;  %v3638_v32 = vpop.f32.mrf.mxu1  ;;  %v1619_v28 = vsub.f32 %v3524_v1, %v1536_v60 }
 0x60f   :  { %v1579_v46 = vmax.f32 %v3636_v50, %v3638_v32 }
 0x611   :  { %1580 = vmax.xlane.f32.xlu0 %v1579_v46 }
 0x615   :  { %v1539_v41 = vpop.xlane.xlu0 %1538 }
 0x616   :  { %v3642_v21 = vpop.f32.mrf.mxu0  ;;  %v3644_v53 = vpop.f32.mrf.mxu1  ;;  %v1621_v46 = vsub.f32 %v3532_v12, %v1539_v41  ;;  %v1622_v54 = vsub.f32 %v3534_v44, %v1539_v41  ;;  %v1620_v12 = vsub.f32 %v3526_v35, %v1536_v60  ;;  %v1705_v41 = vmul.f32 1.442695, %v1619_v28 }
 0x617   :  { %v1582_v52 = vmax.f32 %v3642_v21, %v3644_v53  ;;  %v3666_v44 = vpop.xlane.xlu2 %1505  ;;  %v1613_v28 = vsub.f32 %v3500_v51, %v3614_v40  ;;  %v1609_v51 = vsub.f32 %v3484_v61, %v3598_v5 }
 0x618   :  { %v1709_v3 = vmul.f32 1.442695, %v1621_v46  ;;  %v1707_v0 = vmul.f32 1.442695, %v1620_v12 }
 0x619   :  { %1583 = vmax.xlane.f32.xlu0 %v1582_v52 }
 0x61d   :  { %v1542_v8 = vpop.xlane.xlu0 %1541 }
 0x61e   :  { %v3648_v36 = vpop.f32.mrf.mxu0  ;;  %v3650_v49 = vpop.f32.mrf.mxu1  ;;  %v1623_v1 = vsub.f32 %v3540_v22, %v1542_v8 }
 0x61f   :  { %v1585_v25 = vmax.f32 %v3648_v36, %v3650_v49 }
 0x620   :  { %v1713_v22 = vmul.f32 1.442695, %v1623_v1 }
 0x621   :  { %1586 = vmax.xlane.f32.xlu0 %v1585_v25 }
 0x625   :  { %v1545_v27 = vpop.xlane.xlu0 %1544 }
 0x626   :  { %v1625_v11 = vsub.f32 %v3548_v14, %v1545_v27  ;;  %v1626_v17 = vsub.f32 %v3550_v33, %v1545_v27  ;;  %v3658_v34 = vpop.f32.mrf.mxu0  ;;  %v3660_v52 = vpop.f32.mrf.mxu1  ;;  %v1711_v14 = vmul.f32 1.442695, %v1622_v54  ;;  %v1615_v33 = vsub.f32 %v3508_v19, %v1530_v20 }
 0x627   :  { %v1588_v57 = vmax.f32 %v3658_v34, %v3660_v52  ;;  %v1616_v27 = vsub.f32 %v3510_v26, %v1530_v20 }
 0x628   :  { %v1717_v18 = vmul.f32 1.442695, %v1625_v11  ;;  %v1719_v25 = vmul.f32 1.442695, %v1626_v17  ;;  %v1624_v17 = vsub.f32 %v3542_v63, %v1542_v8  ;;  %v1697_v11 = vmul.f32 1.442695, %v1615_v33  ;;  %v3686_v63 = vpop.xlane.xlu2 %1514 }
 0x629   :  { %1589 = vmax.xlane.f32.xlu0 %v1588_v57  ;;  %v1699_v26 = vmul.f32 1.442695, %v1616_v27  ;;  %v1614_v8 = vsub.f32 %v3502_v38, %v3614_v40  ;;  %v1610_v38 = vsub.f32 %v3486_v6, %v3598_v5  ;;  %v1685_v6 = vmul.f32 1.442695, %v1609_v51 }
 0x62a   :  { %2428 = vpow2.f32 %v1717_v18  ;;  %v1715_v54 = vmul.f32 1.442695, %v1624_v17 }
 0x62b   :  { %2430 = vpow2.f32 %v1719_v25  ;;  %v1695_v40 = vmul.f32 1.442695, %v1614_v8  ;;  %v1617_v25 = vsub.f32 %v3516_v37, %v3628_v10  ;;  %v1687_v1 = vmul.f32 1.442695, %v1610_v38 }
 0x62c   :  { %2432 = vpow2.f32 %v1709_v3 }
 0x62d   :  { %2434 = vpow2.f32 %v1711_v14  ;;  %v1618_v14 = vsub.f32 %v3518_v42, %v3628_v10  ;;  %v1608_v10 = vsub.f32 %v3476_v59, %v3590_v39  ;;  %v1701_v17 = vmul.f32 1.442695, %v1617_v25 }
 0x62e   :  { %v3672_v35 = vpop.f32.mrf.mxu0  ;;  %v3674_v57 = vpop.f32.mrf.mxu1  ;;  %2436 = vpow2.f32 %v1705_v41  ;;  %v1607_v41 = vsub.f32 %v3474_v2, %v3590_v39  ;;  %v1611_v2 = vsub.f32 %v3492_v23, %v3606_v43  ;;  %v1612_v39 = vsub.f32 %v3494_v7, %v3606_v43 }
 0x62f   :  { %v1591_v18 = vmax.f32 %v3672_v35, %v3674_v57  ;;  %2438 = vpow2.f32 %v1707_v0  ;;  %v1693_v0 = vmul.f32 1.442695, %v1613_v28 }
 0x630   :  { %v3678_v19 = vpop.eup %2428  ;;  %2440 = vpow2.f32 %v1697_v11  ;;  %v1548_v28 = vpop.xlane.xlu2 %1547  ;;  %v1681_v59 = vmul.f32 1.442695, %v1607_v41  ;;  %v1689_v23 = vmul.f32 1.442695, %v1611_v2  ;;  %v1691_v7 = vmul.f32 1.442695, %v1612_v39 }
 0x631   :  { %v3682_v3 = vpop.eup %2430  ;;  %1592 = vmax.xlane.f32.xlu0 %v1591_v18  ;;  %2442 = vpow2.f32 %v1699_v26  ;;  %v1703_v18 = vmul.f32 1.442695, %v1618_v14  ;;  %v1628_v38 = vsub.f32 %v3558_v15, %v1548_v28 }
 0x632   :  { %v1831_v20 = vadd.f32 %v3682_v3, %v3678_v19  ;;  %v3690_v60 = vpop.eup %2432  ;;  %2444 = vpow2.f32 %v1713_v22 }
 0x633   :  { %v3694_v46 = vpop.eup %2434  ;;  %2446 = vpow2.f32 %v1715_v54  ;;  %v1683_v54 = vmul.f32 1.442695, %v1608_v10  ;;  %v1723_v15 = vmul.f32 1.442695, %v1628_v38 }
 0x634   :  { %1832 = vadd.xlane.f32.xlu2 %v1831_v20  ;;  %v3700_v12 = vpop.eup %2436  ;;  %v1825_v37 = vadd.f32 %v3694_v46, %v3690_v60  ;;  %2448 = vpow2.f32 %v1693_v0  ;;  %v1627_v20 = vsub.f32 %v3556_v9, %v1548_v28 }
 0x635   :  { %v3708_v27 = vpop.eup %2438  ;;  %2450 = vpow2.f32 %v1695_v40 }
 0x636   :  { %v3704_v61 = vpop.f32.mrf.mxu0  ;;  %v3706_v33 = vpop.f32.mrf.mxu1  ;;  %v1822_v26 = vadd.f32 %v3708_v27, %v3700_v12  ;;  %2452 = vpow2.f32 %v1685_v6  ;;  %v1721_v9 = vmul.f32 1.442695, %v1627_v20 }
 0x637   :  { %v1594_v5 = vmax.f32 %v3704_v61, %v3706_v33  ;;  %v3716_v42 = vpop.eup %2440  ;;  %2454 = vpow2.f32 %v1687_v1 }
 0x638   :  { %v3720_v11 = vpop.eup %2442  ;;  %2456 = vpow2.f32 %v1701_v17 }
 0x639   :  { %1826 = vadd.xlane.f32.xlu0 %v1825_v37  ;;  %1595 = vmax.xlane.f32.xlu1 %v1594_v5  ;;  %v3724_v8 = vpop.eup %2444  ;;  %2458 = vpow2.f32 %v1703_v18  ;;  %v1816_v40 = vadd.f32 %v3720_v11, %v3716_v42 }
 0x63a   :  { %v3728_v22 = vpop.eup %2446  ;;  %2460 = vpow2.f32 %v1681_v59 }
 0x63b   :  { %v3733_v51 = vpop.eup %2448  ;;  %v1828_v25 = vadd.f32 %v3728_v22, %v3724_v8  ;;  %2462 = vpow2.f32 %v1683_v54 }
 0x63c   :  { %1823 = vadd.xlane.f32.xlu2 %v1822_v26  ;;  %v3736_v0 = vpop.eup %2450  ;;  %2464 = vpow2.f32 %v1689_v23  ;;  %v3770_v39 = vpop.xlane.xlu0 %1553 }
 0x63d   :  { %4359 = vst [vmem:[#allocation18_spill] sm:$0xff] %v3736_v0  ;;  %v3742_v43 = vpop.eup %2452  ;;  %v1813_v6 = vadd.f32 %v3736_v0, %v3733_v51  ;;  %2466 = vpow2.f32 %v1691_v7 }
 0x63e   :  { %v3744_v14 = vpop.eup %2454  ;;  %2468 = vpow2.f32 %v1721_v9 }
 0x63f   :  { %4360 = vst [vmem:[#allocation19_spill] sm:$0xff] %v3744_v14  ;;  %v3748_v5 = vpop.eup %2456  ;;  %2470 = vpow2.f32 %v1723_v15  ;;  %v1807_v10 = vadd.f32 %v3744_v14, %v3742_v43 }
 0x640   :  { %v3750_v37 = vpop.eup %2458 }
 0x641   :  { %1817 = vadd.xlane.f32.xlu0 %v1816_v40  ;;  %1829 = vadd.xlane.f32.xlu1 %v1828_v25  ;;  %v3752_v41 = vpop.eup %2460  ;;  %v1819_v17 = vadd.f32 %v3750_v37, %v3748_v5 }
 0x642   :  { %v3754_v1 = vpop.eup %2462 }
 0x643   :  { %4361 = vst [vmem:[#allocation32_spill] sm:$0xff] %v3754_v1  ;;  %v3760_v18 = vpop.eup %2464  ;;  %v1804_v26 = vadd.f32 %v3754_v1, %v3752_v41 }
 0x644   :  { %1814 = vadd.xlane.f32.xlu2 %v1813_v6  ;;  %v3762_v28 = vpop.eup %2466 }
 0x645   :  { %4362 = vst [vmem:[#allocation33_spill] sm:$0xff] %v3762_v28  ;;  %v3766_v2 = vpop.eup %2468  ;;  %v1810_v20 = vadd.f32 %v3762_v28, %v3760_v18 }
 0x646   :  { %v3768_v59 = vpop.eup %2470 }
 0x647   :  { %v1834_v54 = vadd.f32 %v3768_v59, %v3766_v2 }
 0x649   :  { %1808 = vadd.xlane.f32.xlu0 %v1807_v10  ;;  %1820 = vadd.xlane.f32.xlu1 %v1819_v17 }
 0x64c   :  { %1805 = vadd.xlane.f32.xlu2 %v1804_v26 }
 0x651   :  { %1835 = vadd.xlane.f32.xlu0 %v1834_v54  ;;  %1811 = vadd.xlane.f32.xlu1 %v1810_v20 }
 0x654   :  { %v3776_v38 = vpop.xlane.xlu0 %1562 }
 0x65c   :  { %v3778_v23 = vpop.xlane.xlu0 %1565 }
 0x664   :  { %v1569_v40 = vpop.xlane.xlu0 %1568 }
 0x665   :  { %v1641_v25 = vsub.f32 %v3608_v24, %v1569_v40  ;;  %v1642_v7 = vsub.f32 %v3610_v30, %v1569_v40 }
 0x667   :  { %v1749_v9 = vmul.f32 1.442695, %v1641_v25  ;;  %v1751_v15 = vmul.f32 1.442695, %v1642_v7 }
 0x669   :  { %2472 = vpow2.f32 %v1749_v9 }
 0x66a   :  { %2474 = vpow2.f32 %v1751_v15 }
 0x66c   :  { %v1572_v6 = vpop.xlane.xlu0 %1571 }
 0x66d   :  { %v1643_v10 = vsub.f32 %v3616_v62, %v1572_v6  ;;  %v1644_v17 = vsub.f32 %v3618_v58, %v1572_v6 }
 0x66f   :  { %v3784_v26 = vpop.eup %2472  ;;  %v1753_v54 = vmul.f32 1.442695, %v1643_v10  ;;  %v1755_v20 = vmul.f32 1.442695, %v1644_v17 }
 0x670   :  { %v3786_v1 = vpop.eup %2474 }
 0x671   :  { %4363 = vst [vmem:[#allocation11_spill] sm:$0xff] %v3786_v1  ;;  %2476 = vpow2.f32 %v1753_v54  ;;  %v1855_v24 = vadd.f32 %v3786_v1, %v3784_v26 }
 0x672   :  { %2478 = vpow2.f32 %v1755_v20 }
 0x673   :  { %1856 = vadd.xlane.f32.xlu1 %v1855_v24 }
 0x674   :  { %v1575_v30 = vpop.xlane.xlu0 %1574 }
 0x675   :  { %v1645_v40 = vsub.f32 %v3622_v29, %v1575_v30  ;;  %v1646_v25 = vsub.f32 %v3624_v45, %v1575_v30 }
 0x677   :  { %v3792_v62 = vpop.eup %2476  ;;  %v1757_v58 = vmul.f32 1.442695, %v1645_v40  ;;  %v1759_v7 = vmul.f32 1.442695, %v1646_v25 }
 0x678   :  { %v3794_v9 = vpop.eup %2478 }
 0x679   :  { %4364 = vst [vmem:[#allocation12_spill] sm:$0xff] %v3794_v9  ;;  %2480 = vpow2.f32 %v1757_v58  ;;  %v1858_v15 = vadd.f32 %v3794_v9, %v3792_v62 }
 0x67a   :  { %2482 = vpow2.f32 %v1759_v7 }
 0x67b   :  { %1859 = vadd.xlane.f32.xlu2 %v1858_v15 }
 0x67c   :  { %v1578_v6 = vpop.xlane.xlu0 %1577 }
 0x67d   :  { %v1647_v10 = vsub.f32 %v3630_v55, %v1578_v6  ;;  %v1648_v17 = vsub.f32 %v3632_v48, %v1578_v6 }
 0x67f   :  { %v3800_v29 = vpop.eup %2480  ;;  %v1761_v45 = vmul.f32 1.442695, %v1647_v10  ;;  %v1763_v54 = vmul.f32 1.442695, %v1648_v17 }
 0x680   :  { %v3802_v20 = vpop.eup %2482 }
 0x681   :  { %4365 = vst [vmem:[#allocation7_spill] sm:$0xff] %v3802_v20  ;;  %2484 = vpow2.f32 %v1761_v45  ;;  %v1861_v24 = vadd.f32 %v3802_v20, %v3800_v29 }
 0x682   :  { %2486 = vpow2.f32 %v1763_v54 }
 0x683   :  { %1862 = vadd.xlane.f32.xlu0 %v1861_v24 }
 0x684   :  { %v1581_v30 = vpop.xlane.xlu0 %1580 }
 0x685   :  { %v1649_v40 = vsub.f32 %v3636_v50, %v1581_v30  ;;  %v1650_v25 = vsub.f32 %v3638_v32, %v1581_v30  ;;  %v3822_v30 = vpop.xlane.xlu1 %1502 }
 0x687   :  { %v3808_v55 = vpop.eup %2484  ;;  %v1765_v48 = vmul.f32 1.442695, %v1649_v40  ;;  %v1767_v58 = vmul.f32 1.442695, %v1650_v25 }
 0x688   :  { %v3810_v7 = vpop.eup %2486 }
 0x689   :  { %4366 = vst [vmem:[#allocation8_spill] sm:$0xff] %v3810_v7  ;;  %2488 = vpow2.f32 %v1765_v48  ;;  %v1864_v15 = vadd.f32 %v3810_v7, %v3808_v55 }
 0x68a   :  { %2490 = vpow2.f32 %v1767_v58 }
 0x68b   :  { %1865 = vadd.xlane.f32.xlu1 %v1864_v15 }
 0x68c   :  { %v1584_v6 = vpop.xlane.xlu0 %1583 }
 0x68d   :  { %v1651_v10 = vsub.f32 %v3642_v21, %v1584_v6  ;;  %v1652_v17 = vsub.f32 %v3644_v53, %v1584_v6 }
 0x68f   :  { %v3816_v50 = vpop.eup %2488  ;;  %v1769_v32 = vmul.f32 1.442695, %v1651_v10  ;;  %v1771_v45 = vmul.f32 1.442695, %v1652_v17  ;;  %v3832_v10 = vpop.xlane.xlu1 %1511 }
 0x690   :  { %v3818_v54 = vpop.eup %2490 }
 0x691   :  { %4367 = vst [vmem:[#allocation34_spill] sm:$0xff] %v3818_v54  ;;  %2492 = vpow2.f32 %v1769_v32  ;;  %v1867_v24 = vadd.f32 %v3818_v54, %v3816_v50 }
 0x692   :  { %2494 = vpow2.f32 %v1771_v45  ;;  %v1637_v45 = vsub.f32 %v3592_v56, %v3776_v38  ;;  %v1601_v56 = vsub.f32 %v3450_v4, %v3582_v16  ;;  %v4369_v4 = vld [vmem:[#allocation29_spill] sm:$0xff] }
 0x693   :  { %1868 = vadd.xlane.f32.xlu2 %v1867_v24 }
 0x694   :  { %v1587_v40 = vpop.xlane.xlu0 %1586 }
 0x695   :  { %v1653_v25 = vsub.f32 %v3648_v36, %v1587_v40  ;;  %v1654_v21 = vsub.f32 %v3650_v49, %v1587_v40 }
 0x697   :  { %v3826_v53 = vpop.eup %2492  ;;  %v1773_v48 = vmul.f32 1.442695, %v1653_v25  ;;  %v1775_v58 = vmul.f32 1.442695, %v1654_v21  ;;  %v1638_v21 = vsub.f32 %v3594_v47, %v3776_v38  ;;  %v1602_v47 = vsub.f32 %v3452_v13, %v3582_v16  ;;  %v3854_v38 = vpop.xlane.xlu2 %1550 }
 0x698   :  { %v3828_v15 = vpop.eup %2494 }
 0x699   :  { %4368 = vst [vmem:[#allocation35_spill] sm:$0xff] %v3828_v15  ;;  %2496 = vpow2.f32 %v1773_v48  ;;  %v1870_v6 = vadd.f32 %v3828_v15, %v3826_v53  ;;  %v1671_v16 = vmul.f32 1.442695, %v1602_v47  ;;  %v4386_v15 = vld [vmem:[#allocation13_spill] sm:$0xff] }
 0x69a   :  { %2498 = vpow2.f32 %v1775_v58  ;;  %v1743_v58 = vmul.f32 1.442695, %v1638_v21  ;;  %v1597_v0 = vsub.f32 %v4386_v15, %v3822_v30 }
 0x69b   :  { %1871 = vadd.xlane.f32.xlu0 %v1870_v6 }
 0x69c   :  { %v1590_v17 = vpop.xlane.xlu0 %1589 }
 0x69d   :  { %v1655_v32 = vsub.f32 %v3658_v34, %v1590_v17  ;;  %v1656_v36 = vsub.f32 %v3660_v52, %v1590_v17  ;;  %v1741_v34 = vmul.f32 1.442695, %v1637_v45  ;;  %v3846_v52 = vpop.xlane.xlu1 %1556  ;;  %v1639_v45 = vsub.f32 %v3600_v31, %v3778_v23 }
 0x69f   :  { %v3836_v49 = vpop.eup %2496  ;;  %v1777_v24 = vmul.f32 1.442695, %v1655_v32  ;;  %v1779_v40 = vmul.f32 1.442695, %v1656_v36 }
 0x6a0   :  { %v3840_v25 = vpop.eup %2498 }
 0x6a1   :  { %2500 = vpow2.f32 %v1777_v24  ;;  %v1873_v48 = vadd.f32 %v3840_v25, %v3836_v49 }
 0x6a2   :  { %2502 = vpow2.f32 %v1779_v40 }
 0x6a3   :  { %1874 = vadd.xlane.f32.xlu1 %v1873_v48  ;;  %2504 = vpow2.f32 %v1741_v34  ;;  %v1745_v48 = vmul.f32 1.442695, %v1639_v45  ;;  %v4370_v34 = vld [vmem:[#allocation22_spill] sm:$0xff]  ;;  %v4373_v45 = vld [vmem:[#allocation21_spill] sm:$0xff] }
 0x6a4   :  { %v1593_v6 = vpop.xlane.xlu0 %1592  ;;  %2506 = vpow2.f32 %v1743_v58  ;;  %v1605_v31 = vsub.f32 %v4370_v34, %v3686_v63  ;;  %v4374_v34 = vld [vmem:[#allocation15_spill] sm:$0xff] }
 0x6a5   :  { %v1657_v17 = vsub.f32 %v3672_v35, %v1593_v6  ;;  %v1658_v32 = vsub.f32 %v3674_v57, %v1593_v6  ;;  %v1640_v35 = vsub.f32 %v4369_v4, %v3778_v23  ;;  %v1669_v57 = vmul.f32 1.442695, %v1601_v56  ;;  %v4371_v23 = vld [vmem:[#allocation20_spill] sm:$0xff] }
 0x6a6   :  { %v1603_v56 = vsub.f32 %v4371_v23, %v3832_v10  ;;  %v1604_v4 = vsub.f32 %v4373_v45, %v3832_v10  ;;  %v1631_v1 = vsub.f32 %v4374_v34, %v3770_v39 }
 0x6a7   :  { %v3856_v36 = vpop.eup %2500  ;;  %v1781_v24 = vmul.f32 1.442695, %v1657_v17  ;;  %v1783_v40 = vmul.f32 1.442695, %v1658_v32  ;;  %v1747_v6 = vmul.f32 1.442695, %v1640_v35  ;;  %v1560_v35 = vpop.xlane.xlu2 %1559 }
 0x6a8   :  { %v3860_v21 = vpop.eup %2502  ;;  %v1673_v10 = vmul.f32 1.442695, %v1603_v56  ;;  %v1729_v34 = vmul.f32 1.442695, %v1631_v1 }
 0x6a9   :  { %2508 = vpow2.f32 %v1781_v24  ;;  %v1876_v13 = vadd.f32 %v3860_v21, %v3856_v36  ;;  %v3870_v58 = vpop.eup %2504 }
 0x6aa   :  { %2510 = vpow2.f32 %v1783_v40  ;;  %v3876_v40 = vpop.eup %2506 }
 0x6ab   :  { %1877 = vadd.xlane.f32.xlu2 %v1876_v13  ;;  %2512 = vpow2.f32 %v1669_v57  ;;  %4372 = vst [vmem:[#allocation5_spill] sm:$0xff] %v3876_v40  ;;  %v1849_v45 = vadd.f32 %v3876_v40, %v3870_v58 }
 0x6ac   :  { %v3868_v17 = vpop.xlane.xlu0 %1826  ;;  %v1596_v32 = vpop.xlane.xlu1 %1595  ;;  %2514 = vpow2.f32 %v1671_v16  ;;  %v4376_v16 = vld [vmem:[#allocation30_spill] sm:$0xff] }
 0x6ad   :  { %v1659_v24 = vsub.f32 %v3704_v61, %v1596_v32  ;;  %v1660_v47 = vsub.f32 %v3706_v33, %v1596_v32  ;;  %2516 = vpow2.f32 %v1745_v48  ;;  %v4375_v61 = vld [vmem:[#allocation23_spill] sm:$0xff]  ;;  %v1677_v32 = vmul.f32 1.442695, %v1605_v31 }
 0x6ae   :  { %v1606_v33 = vsub.f32 %v4375_v61, %v3686_v63  ;;  %v1632_v20 = vsub.f32 %v4376_v16, %v3770_v39  ;;  %2518 = vpow2.f32 %v1747_v6  ;;  %v4380_v16 = vld [vmem:[#allocation26_spill] sm:$0xff] }
 0x6af   :  { %v3880_v13 = vpop.eup %2508  ;;  %v1785_v57 = vmul.f32 1.442695, %v1659_v24  ;;  %v1787_v9 = vmul.f32 1.442695, %v1660_v47  ;;  %v1675_v24 = vmul.f32 1.442695, %v1604_v4  ;;  %v1833_v61 = vpop.xlane.xlu2 %1832 }
 0x6b0   :  { %v3884_v23 = vpop.eup %2510  ;;  %v1731_v39 = vmul.f32 1.442695, %v1632_v20  ;;  %v1679_v56 = vmul.f32 1.442695, %v1606_v33 }
 0x6b1   :  { %2520 = vpow2.f32 %v1785_v57  ;;  %v1879_v48 = vadd.f32 %v3884_v23, %v3880_v13  ;;  %v3894_v47 = vpop.eup %2512 }
 0x6b2   :  { %2522 = vpow2.f32 %v1787_v9  ;;  %v3896_v63 = vpop.eup %2514  ;;  %v4379_v9 = vld [vmem:[#allocation31_spill] sm:$0xff] }
 0x6b3   :  { %1850 = vadd.xlane.f32.xlu2 %v1849_v45  ;;  %1880 = vadd.xlane.f32.xlu0 %v1879_v48  ;;  %4377 = vst [vmem:[#allocation29_spill] sm:$0xff] %v3896_v63  ;;  %2524 = vpow2.f32 %v1677_v32  ;;  %v3900_v6 = vpop.eup %2516  ;;  %v1633_v4 = vsub.f32 %v4379_v9, %v3846_v52  ;;  %v1634_v32 = vsub.f32 %v4380_v16, %v3846_v52  ;;  %v4381_v45 = vld [vmem:[#allocation27_spill] sm:$0xff]  ;;  %v4383_v52 = vld [vmem:[#allocation9_spill] sm:$0xff] }
 0x6b4   :  { %v3898_v31 = vpop.xlane.xlu0 %1817  ;;  %2526 = vpow2.f32 %v1673_v10  ;;  %v3902_v57 = vpop.eup %2518  ;;  %v1635_v48 = vsub.f32 %v4381_v45, %v1560_v35  ;;  %v1795_v33 = vadd.f32 %v3896_v63, %v3894_v47  ;;  %v4382_v10 = vld [vmem:[#allocation28_spill] sm:$0xff]  ;;  %v1599_v16 = vsub.f32 %v4383_v52, %v3666_v44  ;;  %v4384_v45 = vld [vmem:[#allocation10_spill] sm:$0xff] }
 0x6b5   :  { %4378 = vst [vmem:[#allocation22_spill] sm:$0xff] %v3902_v57  ;;  %2528 = vpow2.f32 %v1675_v24  ;;  %v1636_v24 = vsub.f32 %v4382_v10, %v1560_v35  ;;  %v1852_v9 = vadd.f32 %v3902_v57, %v3900_v6  ;;  %v1600_v63 = vsub.f32 %v4384_v45, %v3666_v44  ;;  %v1830_v57 = vpop.xlane.xlu1 %1829 }
 0x6b6   :  { %2530 = vpow2.f32 %v1729_v34  ;;  %v1737_v10 = vmul.f32 1.442695, %v1635_v48  ;;  %v4387_v48 = vld [vmem:[#allocation14_spill] sm:$0xff] }
 0x6b7   :  { %v3906_v1 = vpop.eup %2520  ;;  %2532 = vpow2.f32 %v1731_v39  ;;  %v1733_v39 = vmul.f32 1.442695, %v1633_v4  ;;  %v1739_v28 = vmul.f32 1.442695, %v1636_v24  ;;  %v1665_v4 = vmul.f32 1.442695, %v1599_v16 }
 0x6b8   :  { %v3910_v20 = vpop.eup %2522  ;;  %2534 = vpow2.f32 %v1679_v56  ;;  %v1735_v56 = vmul.f32 1.442695, %v1634_v32  ;;  %v1667_v32 = vmul.f32 1.442695, %v1600_v63  ;;  %v1661_v16 = vmul.f32 1.442695, %v1597_v0 }
 0x6b9   :  { %v1882_v34 = vadd.f32 %v3910_v20, %v3906_v1  ;;  %v3920_v40 = vpop.eup %2524  ;;  %2536 = vpow2.f32 %v1733_v39  ;;  %v4389_v0 = vld [vmem:[#allocation24_spill] sm:$0xff] }
 0x6ba   :  { %v3924_v7 = vpop.eup %2526  ;;  %2538 = vpow2.f32 %v1735_v56  ;;  %v1629_v56 = vsub.f32 %v4389_v0, %v3854_v38 }
 0x6bb   :  { %1796 = vadd.xlane.f32.xlu2 %v1795_v33  ;;  %1853 = vadd.xlane.f32.xlu0 %v1852_v9  ;;  %v3928_v35 = vpop.eup %2528  ;;  %v1598_v33 = vsub.f32 %v4387_v48, %v3822_v30  ;;  %2540 = vpow2.f32 %v1737_v10  ;;  %v1824_v9 = vpop.xlane.xlu2 %1823 }
 0x6bc   :  { %1883 = vadd.xlane.f32.xlu1 %v1882_v34  ;;  %v3930_v14 = vpop.xlane.xlu0 %1808  ;;  %v3932_v54 = vpop.eup %2530  ;;  %2542 = vpow2.f32 %v1739_v28  ;;  %v1798_v34 = vadd.f32 %v3928_v35, %v3924_v7 }
 0x6bd   :  { %v3934_v52 = vpop.eup %2532  ;;  %2544 = vpow2.f32 %v1665_v4  ;;  %v1663_v30 = vmul.f32 1.442695, %v1598_v33  ;;  %v1821_v10 = vpop.xlane.xlu1 %1820 }
 0x6be   :  { %4385 = vst [vmem:[#allocation20_spill] sm:$0xff] %v3934_v52  ;;  %v3938_v44 = vpop.eup %2534  ;;  %v1840_v24 = vadd.f32 %v3934_v52, %v3932_v54  ;;  %2546 = vpow2.f32 %v1667_v32 }
 0x6bf   :  { %v1801_v15 = vadd.f32 %v3938_v44, %v3920_v40  ;;  %v3948_v63 = vpop.eup %2536  ;;  %2548 = vrcp.f32 %v1833_v61  ;;  %v4391_v61 = vld [vmem:[#allocation25_spill] sm:$0xff] }
 0x6c0   :  { %v3950_v39 = vpop.eup %2538  ;;  %v1630_v48 = vsub.f32 %v4391_v61, %v3854_v38 }
 0x6c1   :  { %4388 = vst [vmem:[#allocation21_spill] sm:$0xff] %v3950_v39  ;;  %v3952_v45 = vpop.eup %2540 }
 0x6c2   :  { %v3956_v4 = vpop.eup %2542  ;;  %v1727_v38 = vmul.f32 1.442695, %v1630_v48 }
 0x6c3   :  { %1841 = vadd.xlane.f32.xlu2 %v1840_v24  ;;  %1799 = vadd.xlane.f32.xlu0 %v1798_v34  ;;  %4390 = vst [vmem:[#allocation15_spill] sm:$0xff] %v3956_v4  ;;  %v3958_v32 = vpop.eup %2544  ;;  %v1843_v24 = vadd.f32 %v3950_v39, %v3948_v63 }
 0x6c4   :  { %1802 = vadd.xlane.f32.xlu1 %v1801_v15  ;;  %v1836_v28 = vpop.xlane.xlu0 %1835  ;;  %v3962_v33 = vpop.eup %2546 }
 0x6c5   :  { %2550 = vrcp.f32 %v1836_v28  ;;  %4392 = vst [vmem:[#allocation23_spill] sm:$0xff] %v3962_v33  ;;  %v3967_v34 = vpop.eup %2548  ;;  %v1815_v15 = vpop.xlane.xlu2 %1814 }
 0x6c6   :  { %2552 = vpow2.f32 %v1661_v16  ;;  %v1725_v16 = vmul.f32 1.442695, %v1629_v56  ;;  %v1945_v56 = vmul.f32 %v3967_v34, %v3678_v19 }
 0x6c7   :  { %2554 = vrcp.f32 %v1830_v57  ;;  %v1846_v57 = vadd.f32 %v3956_v4, %v3952_v45 }
 0x6c8   :  { %2556 = vpow2.f32 %v1663_v30 }
 0x6c9   :  { %2558 = vrcp.f32 %v3868_v17 }
 0x6ca   :  { %2560 = vrcp.f32 %v1824_v9  ;;  %v1812_v9 = vpop.xlane.xlu1 %1811 }
 0x6cb   :  { %v3971_v28 = vpop.eup %2550  ;;  %1844 = vadd.xlane.f32.xlu0 %v1843_v24  ;;  %2562 = vrcp.f32 %v1821_v10  ;;  %v1792_v24 = vadd.f32 %v3962_v33, %v3958_v32 }
 0x6cc   :  { %v3973_v30 = vpop.eup %2552  ;;  %1847 = vadd.xlane.f32.xlu1 %v1846_v57  ;;  %v1947_v17 = vmul.f32 %v3971_v28, %v3766_v2  ;;  %2564 = vpow2.f32 %v1725_v16 }
 0x6cd   :  { %v3977_v0 = vpop.eup %2554  ;;  %2566 = vrcp.f32 %v3898_v31 }
 0x6ce   :  { %v3979_v61 = vpop.eup %2556  ;;  %1981 = vmatpush.msra.mxu2 %v1947_v17  ;;  %2568 = vpow2.f32 %v1727_v38  ;;  %v1943_v2 = vmul.f32 %v3977_v0, %v3724_v8  ;;  %v1806_v8 = vpop.xlane.xlu2 %1805 }
 0x6cf   :  { %4393 = vst [vmem:[#allocation30_spill] sm:$0xff] %v3979_v61  ;;  %v3983_v52 = vpop.eup %2558  ;;  %2570 = vrcp.f32 %v1815_v15  ;;  %v1789_v10 = vadd.f32 %v3979_v61, %v3973_v30 }
 0x6d0   :  { %1982 = vmatpush.msra.mxu2 %v1945_v56  ;;  %v3988_v48 = vpop.eup %2560  ;;  %v1941_v19 = vmul.f32 %v3983_v52, %v3690_v60  ;;  %2572 = vrcp.f32 %v1812_v9 }
 0x6d1   :  { %v3996_v31 = vpop.eup %2562  ;;  %v1939_v15 = vmul.f32 %v3988_v48, %v3700_v12  ;;  %2574 = vrcp.f32 %v3930_v14 }
 0x6d2   :  { %1983 = vmatpush.msra.mxu2 %v1943_v2  ;;  %v3998_v16 = vpop.eup %2564  ;;  %v1937_v60 = vmul.f32 %v3996_v31, %v3748_v5  ;;  %2576 = vrcp.f32 %v1806_v8 }
 0x6d3   :  { %1790 = vadd.xlane.f32.xlu0 %v1789_v10  ;;  %v4002_v57 = vpop.eup %2566 }
 0x6d4   :  { %1793 = vadd.xlane.f32.xlu1 %v1792_v24  ;;  %1984 = vmatpush.msra.mxu2 %v1941_v19  ;;  %v4005_v38 = vpop.eup %2568  ;;  %v1935_v56 = vmul.f32 %v4002_v57, %v3716_v42 }
 0x6d5   :  { %4394 = vst [vmem:[#allocation31_spill] sm:$0xff] %v4005_v38  ;;  %v4009_v17 = vpop.eup %2570  ;;  %v1837_v12 = vadd.f32 %v4005_v38, %v3998_v16 }
 0x6d6   :  { %1985 = vmatpush.msra.mxu2 %v1939_v15  ;;  %v4013_v9 = vpop.eup %2572  ;;  %v1933_v14 = vmul.f32 %v4009_v17, %v3733_v51 }
 0x6d7   :  { %v4019_v2 = vpop.eup %2574  ;;  %v1931_v5 = vmul.f32 %v4013_v9, %v3760_v18 }
 0x6d8   :  { %1986 = vmatpush.msra.mxu2 %v1937_v60  ;;  %v4023_v10 = vpop.eup %2576  ;;  %v1929_v42 = vmul.f32 %v4019_v2, %v3742_v43 }
 0x6d9   :  { %v1927_v24 = vmul.f32 %v4023_v10, %v3752_v41 }
 0x6da   :  { %1987 = vmatpush.msra.mxu2 %v1935_v56 }
 0x6dc   :  { %1838 = vadd.xlane.f32.xlu1 %v1837_v12  ;;  %1988 = vmatpush.msra.mxu2 %v1933_v14 }
 0x6de   :  { %1989 = vmatpush.msra.mxu2 %v1931_v5 }
 0x6e0   :  { %1990 = vmatpush.msra.mxu2 %v1929_v42 }
 0x6e2   :  { %1991 = vmatpush.msra.mxu2 %v1927_v24 }
 0x6e6   :  { %v1857_v8 = vpop.xlane.xlu1 %1856 }
 0x6ee   :  { %v1860_v19 = vpop.xlane.xlu2 %1859 }
 0x6f6   :  { %v1863_v51 = vpop.xlane.xlu0 %1862 }
 0x6fe   :  { %v1866_v56 = vpop.xlane.xlu1 %1865 }
 0x706   :  { %v1869_v15 = vpop.xlane.xlu2 %1868 }
 0x70e   :  { %v1872_v60 = vpop.xlane.xlu0 %1871 }
 0x716   :  { %v1875_v18 = vpop.xlane.xlu1 %1874 }
 0x71e   :  { %v1878_v12 = vpop.xlane.xlu2 %1877 }
 0x726   :  { %v1881_v14 = vpop.xlane.xlu0 %1880  ;;  %v1851_v38 = vpop.xlane.xlu2 %1850 }
 0x727   :  { %2578 = vrcp.f32 %v1881_v14 }
 0x72d   :  { %v4029_v43 = vpop.eup %2578 }
 0x72e   :  { %v1854_v39 = vpop.xlane.xlu0 %1853  ;;  %v1797_v4 = vpop.xlane.xlu2 %1796 }
 0x72f   :  { %v1884_v5 = vpop.xlane.xlu1 %1883 }
 0x730   :  { %2580 = vrcp.f32 %v1884_v5 }
 0x731   :  { %2582 = vrcp.f32 %v1878_v12  ;;  %v1977_v12 = vmul.f32 %v4029_v43, %v3880_v13 }
 0x732   :  { %2584 = vrcp.f32 %v1875_v18 }
 0x733   :  { %2586 = vrcp.f32 %v1869_v15 }
 0x734   :  { %2588 = vrcp.f32 %v1872_v60 }
 0x736   :  { %v1800_v41 = vpop.xlane.xlu0 %1799  ;;  %v4031_v42 = vpop.eup %2580 }
 0x737   :  { %v1803_v24 = vpop.xlane.xlu1 %1802  ;;  %2590 = vrcp.f32 %v1800_v41  ;;  %v1979_v61 = vmul.f32 %v4031_v42, %v3906_v1  ;;  %v4035_v33 = vpop.eup %2582 }
 0x738   :  { %2592 = vrcp.f32 %v1803_v24  ;;  %v4039_v14 = vpop.eup %2584  ;;  %v1975_v60 = vmul.f32 %v4035_v33, %v3856_v36 }
 0x739   :  { %2594 = vrcp.f32 %v1866_v56  ;;  %2001 = vmatpush.msra.mxu3 %v1979_v61  ;;  %v4041_v15 = vpop.eup %2586  ;;  %v1973_v61 = vmul.f32 %v4039_v14, %v3836_v49 }
 0x73a   :  { %2596 = vrcp.f32 %v1797_v4  ;;  %v4045_v18 = vpop.eup %2588 }
 0x73b   :  { %2002 = vmatpush.msra.mxu3 %v1977_v12  ;;  %2598 = vrcp.f32 %v1863_v51  ;;  %v1971_v51 = vmul.f32 %v4045_v18, %v3826_v53 }
 0x73c   :  { %2600 = vrcp.f32 %v1860_v19  ;;  %v1969_v19 = vmul.f32 %v4041_v15, %v3816_v50 }
 0x73d   :  { %v4047_v1 = vpop.eup %2590  ;;  %2003 = vmatpush.msra.mxu3 %v1975_v60  ;;  %2602 = vrcp.f32 %v1857_v8  ;;  %v1842_v60 = vpop.xlane.xlu2 %1841 }
 0x73e   :  { %v1845_v56 = vpop.xlane.xlu0 %1844  ;;  %v4051_v13 = vpop.eup %2592  ;;  %v1923_v49 = vmul.f32 %v4047_v1, %v3924_v7  ;;  %2604 = vrcp.f32 %v1854_v39 }
 0x73f   :  { %v1848_v4 = vpop.xlane.xlu1 %1847  ;;  %v4053_v5 = vpop.eup %2594  ;;  %2004 = vmatpush.msra.mxu3 %v1973_v61  ;;  %v1925_v36 = vmul.f32 %v4051_v13, %v3920_v40  ;;  %2606 = vrcp.f32 %v1851_v38 }
 0x740   :  { %v4059_v41 = vpop.eup %2596  ;;  %v1967_v53 = vmul.f32 %v4053_v5, %v3808_v55  ;;  %2608 = vrcp.f32 %v1848_v4 }
 0x741   :  { %1992 = vmatpush.msra.mxu2 %v1925_v36  ;;  %2005 = vmatpush.msra.mxu3 %v1971_v51  ;;  %v4065_v24 = vpop.eup %2598  ;;  %v1921_v40 = vmul.f32 %v4059_v41, %v3894_v47 }
 0x742   :  { %v4071_v8 = vpop.eup %2600  ;;  %v1965_v50 = vmul.f32 %v4065_v24, %v3800_v29 }
 0x743   :  { %1993 = vmatpush.msra.mxu2 %v1923_v49  ;;  %2006 = vmatpush.msra.mxu3 %v1969_v19  ;;  %v4075_v12 = vpop.eup %2602  ;;  %v1963_v55 = vmul.f32 %v4071_v8, %v3792_v62 }
 0x744   :  { %v4079_v47 = vpop.eup %2604  ;;  %v1961_v38 = vmul.f32 %v4075_v12, %v3784_v26 }
 0x745   :  { %1994 = vmatpush.msra.mxu2 %v1921_v40  ;;  %2007 = vmatpush.msra.mxu3 %v1967_v53  ;;  %v4083_v61 = vpop.eup %2606  ;;  %v1959_v4 = vmul.f32 %v4079_v47, %v3900_v6  ;;  %v1948_v53 = vmul.f32 %v3971_v28, %v3768_v59  ;;  %v1942_v28 = vmul.f32 %v3983_v52, %v3694_v46 }
 0x746   :  { %v1791_v7 = vpop.xlane.xlu0 %1790  ;;  %v4085_v29 = vpop.eup %2608  ;;  %v1957_v62 = vmul.f32 %v4083_v61, %v3870_v58  ;;  %v1976_v46 = vmul.f32 %v4035_v33, %v3860_v21  ;;  %v1974_v52 = vmul.f32 %v4039_v14, %v3840_v25  ;;  %v4400_v33 = vld [vmem:[#allocation34_spill] sm:$0xff] }
 0x747   :  { %2610 = vrcp.f32 %v1791_v7  ;;  %v1794_v39 = vpop.xlane.xlu1 %1793  ;;  %2008 = vmatpush.msra.mxu3 %v1965_v50  ;;  %v1955_v19 = vmul.f32 %v4085_v29, %v3952_v45  ;;  %v1946_v7 = vmul.f32 %v3967_v34, %v3682_v3  ;;  %v1940_v3 = vmul.f32 %v3988_v48, %v3708_v27  ;;  %v4397_v27 = vld [vmem:[#allocation18_spill] sm:$0xff] }
 0x748   :  { %2612 = vrcp.f32 %v1794_v39  ;;  %v1938_v34 = vmul.f32 %v3996_v31, %v3750_v37  ;;  %v4399_v37 = vld [vmem:[#allocation33_spill] sm:$0xff]  ;;  %v1970_v31 = vmul.f32 %v4041_v15, %v4400_v33  ;;  %v4405_v15 = vld [vmem:[#allocation12_spill] sm:$0xff] }
 0x749   :  { %2614 = vrcp.f32 %v1845_v56  ;;  %2009 = vmatpush.msra.mxu3 %v1963_v55  ;;  %v1932_v21 = vmul.f32 %v4013_v9, %v4399_v37  ;;  %v1926_v9 = vmul.f32 %v4051_v13, %v3938_v44  ;;  %v4409_v44 = vld [vmem:[#allocation23_spill] sm:$0xff] }
 0x74a   :  { %2616 = vrcp.f32 %v1842_v60  ;;  %v4408_v60 = vld [vmem:[#allocation22_spill] sm:$0xff] }
 0x74b   :  { %2010 = vmatpush.msra.mxu3 %v1961_v38  ;;  %v1960_v55 = vmul.f32 %v4079_v47, %v4408_v60 }
 0x74d   :  { %v4089_v36 = vpop.eup %2610  ;;  %2011 = vmatpush.msra.mxu3 %v1959_v4 }
 0x74e   :  { %v4091_v51 = vpop.eup %2612  ;;  %v1917_v40 = vmul.f32 %v4089_v36, %v3973_v30  ;;  %v4396_v30 = vld [vmem:[#allocation17_spill] sm:$0xff] }
 0x74f   :  { %v4095_v56 = vpop.eup %2614  ;;  %v1839_v26 = vpop.xlane.xlu1 %1838  ;;  %v1919_v49 = vmul.f32 %v4091_v51, %v3958_v32  ;;  %2012 = vmatpush.msra.mxu3 %v1957_v62  ;;  %v4395_v32 = vld [vmem:[#allocation16_spill] sm:$0xff]  ;;  %v1920_v13 = vmul.f32 %v4091_v51, %v4409_v44 }
 0x750   :  { %2618 = vrcp.f32 %v1839_v26  ;;  %v4101_v6 = vpop.eup %2616  ;;  %v1953_v58 = vmul.f32 %v4095_v56, %v3948_v63  ;;  %v1944_v63 = vmul.f32 %v3977_v0, %v3728_v22  ;;  %v1978_v22 = vmul.f32 %v4029_v43, %v3884_v23  ;;  %v4398_v0 = vld [vmem:[#allocation35_spill] sm:$0xff]  ;;  %v4414_v51 = vld [vmem:[#allocation20_spill] sm:$0xff] }
 0x751   :  { %1995 = vmatpush.msra.mxu2 %v1919_v49  ;;  %2013 = vmatpush.msra.mxu3 %v1955_v19  ;;  %v1951_v45 = vmul.f32 %v4101_v6, %v3932_v54  ;;  %v1980_v54 = vmul.f32 %v4031_v42, %v3910_v20  ;;  %v1936_v20 = vmul.f32 %v4002_v57, %v3720_v11  ;;  %v4401_v11 = vld [vmem:[#allocation19_spill] sm:$0xff] }
 0x752   :  { %v1934_v23 = vmul.f32 %v4009_v17, %v4397_v27  ;;  %v1972_v48 = vmul.f32 %v4045_v18, %v4398_v0  ;;  %v1930_v25 = vmul.f32 %v4019_v2, %v4401_v11  ;;  %v4403_v17 = vld [vmem:[#allocation32_spill] sm:$0xff]  ;;  %v4404_v42 = vld [vmem:[#allocation7_spill] sm:$0xff]  ;;  %v1964_v18 = vmul.f32 %v4071_v8, %v4405_v15  ;;  %v4410_v8 = vld [vmem:[#allocation5_spill] sm:$0xff] }
 0x753   :  { %1996 = vmatpush.msra.mxu2 %v1917_v40  ;;  %2014 = vmatpush.msra.mxu3 %v1953_v58  ;;  %v1928_v43 = vmul.f32 %v4023_v10, %v4403_v17  ;;  %v1966_v14 = vmul.f32 %v4065_v24, %v4404_v42  ;;  %v1924_v2 = vmul.f32 %v4047_v1, %v3928_v35  ;;  %v4407_v10 = vld [vmem:[#allocation29_spill] sm:$0xff]  ;;  %v4411_v35 = vld [vmem:[#allocation30_spill] sm:$0xff] }
 0x754   :  { %1997 = vmatmul.f32.vlgmr.msra.gmra.mxu2 %v4395_v32  ;;  %v1922_v24 = vmul.f32 %v4059_v41, %v4407_v10  ;;  %v1958_v38 = vmul.f32 %v4083_v61, %v4410_v8  ;;  %v1918_v1 = vmul.f32 %v4089_v36, %v4411_v35  ;;  %v4413_v41 = vld [vmem:[#allocation21_spill] sm:$0xff]  ;;  %v1952_v62 = vmul.f32 %v4101_v6, %v4414_v51  ;;  %v4415_v61 = vld [vmem:[#allocation31_spill] sm:$0xff] }
 0x755   :  { %2021 = vmatpush.msrb.mxu2 %v1948_v53  ;;  %2015 = vmatpush.msra.mxu3 %v1951_v45  ;;  %v1954_v47 = vmul.f32 %v4095_v56, %v4413_v41  ;;  %v4416_v53 = vld [vmem:[#allocation6_spill] sm:$0xff] }
 0x756   :  { %v4114_v50 = vpop.eup %2618 }
 0x757   :  { %2022 = vmatpush.msrb.mxu2 %v1946_v7  ;;  %v1949_v59 = vmul.f32 %v4114_v50, %v3998_v16  ;;  %v4402_v16 = vld [vmem:[#allocation8_spill] sm:$0xff]  ;;  %v1950_v26 = vmul.f32 %v4114_v50, %v4415_v61 }
 0x758   :  { %v1968_v57 = vmul.f32 %v4053_v5, %v4402_v16  ;;  %v4406_v5 = vld [vmem:[#allocation11_spill] sm:$0xff] }
 0x759   :  { %2023 = vmatpush.msrb.mxu2 %v1944_v63  ;;  %2016 = vmatpush.msra.mxu3 %v1949_v59  ;;  %v1962_v39 = vmul.f32 %v4075_v12, %v4406_v5  ;;  %v4412_v12 = vld [vmem:[#allocation15_spill] sm:$0xff] }
 0x75a   :  { %2017 = vmatmul.f32.vlgmr.msra.gmra.mxu3 %v4396_v30  ;;  %v1956_v4 = vmul.f32 %v4085_v29, %v4412_v12 }
 0x75b   :  { %2024 = vmatpush.msrb.mxu2 %v1942_v28  ;;  %2041 = vmatpush.msrb.mxu3 %v1980_v54 }
 0x75d   :  { %2025 = vmatpush.msrb.mxu2 %v1940_v3  ;;  %2042 = vmatpush.msrb.mxu3 %v1978_v22 }
 0x75f   :  { %2026 = vmatpush.msrb.mxu2 %v1938_v34  ;;  %2043 = vmatpush.msrb.mxu3 %v1976_v46 }
 0x761   :  { %2027 = vmatpush.msrb.mxu2 %v1936_v20  ;;  %2044 = vmatpush.msrb.mxu3 %v1974_v52 }
 0x763   :  { %2028 = vmatpush.msrb.mxu2 %v1934_v23  ;;  %2045 = vmatpush.msrb.mxu3 %v1972_v48 }
 0x765   :  { %2029 = vmatpush.msrb.mxu2 %v1932_v21  ;;  %2046 = vmatpush.msrb.mxu3 %v1970_v31 }
 0x767   :  { %2030 = vmatpush.msrb.mxu2 %v1930_v25  ;;  %2047 = vmatpush.msrb.mxu3 %v1968_v57 }
 0x769   :  { %2031 = vmatpush.msrb.mxu2 %v1928_v43  ;;  %2048 = vmatpush.msrb.mxu3 %v1966_v14 }
 0x76b   :  { %2032 = vmatpush.msrb.mxu2 %v1926_v9  ;;  %2049 = vmatpush.msrb.mxu3 %v1964_v18 }
 0x76d   :  { %2033 = vmatpush.msrb.mxu2 %v1924_v2  ;;  %2050 = vmatpush.msrb.mxu3 %v1962_v39 }
 0x76f   :  { %2034 = vmatpush.msrb.mxu2 %v1922_v24  ;;  %2051 = vmatpush.msrb.mxu3 %v1960_v55 }
 0x771   :  { %2035 = vmatpush.msrb.mxu2 %v1920_v13  ;;  %2052 = vmatpush.msrb.mxu3 %v1958_v38 }
 0x773   :  { %2036 = vmatpush.msrb.mxu2 %v1918_v1  ;;  %2053 = vmatpush.msrb.mxu3 %v1956_v4 }
 0x774   :  { %2037 = vmatmul.f32.vlgmr.msrb.gmra.mxu2 %v4395_v32 }
 0x775   :  { %2054 = vmatpush.msrb.mxu3 %v1954_v47 }
 0x777   :  { %2055 = vmatpush.msrb.mxu3 %v1952_v62 }
 0x779   :  { %2056 = vmatpush.msrb.mxu3 %v1950_v26 }
 0x77a   :  { %2057 = vmatmul.f32.vlgmr.msrb.gmra.mxu3 %v4396_v30 }
 0x7d7   :  { %v1998_v36 = vpop.f32.mrf.mxu2 }
 0x7dd   :  { %v2018_v29 = vpop.f32.mrf.mxu3 }
 0x7de   :  { %v2019_v56 = vadd.f32 %v2018_v29, %v1998_v36 }
 0x7f7   :  { %v2038_v49 = vpop.f32.mrf.mxu2 }
 0x7fd   :  { %v2058_v19 = vpop.f32.mrf.mxu3 }
 0x7fe   :  { %v2059_v40 = vadd.f32 %v2058_v19, %v2038_v49 }
 0x800   :  { %v2063_v6 = vrot.slane %v2059_v40, 4 }
 0x802   :  { %v2064_v58 = vsel %vm30_vm0, %v2019_v56, %v2063_v6 }
 0x803   :  { %v2066_v32 = vadd.f32 %v4416_v53, %v2064_v58 }
 0x805   :  { %2068 = vst [vmem:[#allocation2 + $0x8] sm:$0xff] %v2066_v32 }
 0x806   :  { %2081 = dma.vmem_to_hbm [thread:$0]  %s2074_s24, 256, %s2076_s27, [#allocation3], %s2647_s28, %s2647_s28, %s2648_s29  }
 0x807   :  { %2644 = dma.done.wait [#allocation3], 256  }
 0x808   :  { %2645 = vsyncadd [#allocation3], 4294967040 }
 0x809   :  { %2086 = vsyncpa [#allocation3], 1 }

</bundles_post_ra>
